<compile_context>
chip_gen: v5e
topology: v5e:2x2
jax: 0.10.0
libtpu: 0.0.40
codegen_flags: <defaults>
</compile_context>

<pallas_src>
import functools
import math

import numpy as np

import jax
import jax.numpy as jnp
from jax.experimental import pallas as pl
from jax.experimental.pallas import tpu as pltpu


# ----------------------------------------------------------------------------
# In-kernel math helpers
# ----------------------------------------------------------------------------
_SQRT_2 = math.sqrt(2.0)


def _erf(x):
    # Abramowitz & Stegun 7.1.26, max abs error ~1.5e-7 (f32-accurate GELU).
    # TODO(synk): switch to lax.erf if/when Mosaic guarantees an erf lowering.
    a1, a2, a3, a4, a5 = 0.254829592, -0.284496736, 1.421413741, -1.453152027, 1.061405429
    p = 0.3275911
    s = jnp.where(x >= 0.0, 1.0, -1.0)
    ax = jnp.abs(x)
    t = 1.0 / (1.0 + p * ax)
    poly = ((((a5 * t + a4) * t + a3) * t + a2) * t + a1) * t
    return s * (1.0 - poly * jnp.exp(-ax * ax))


def _gelu_exact(x):
    # nn.GELU() default (erf form).
    return 0.5 * x * (1.0 + _erf(x / _SQRT_2))


def _tree_sum(terms):
    """Pairwise tree sum: shortens the serial add chain of the 9 conv taps."""
    while len(terms) > 1:
        nxt = [terms[i] + terms[i + 1] for i in range(0, len(terms) - 1, 2)]
        if len(terms) % 2:
            nxt.append(terms[-1])
        terms = nxt
    return terms[0]


def _conv_gn_gelu(xc, mask_ref, wstack_ref, b_ref, gamma_ref, beta_ref, gmix_ref, width):
    """Conv2d(3x3, s=1, p=1) + GroupNorm(8) + GELU for one sample, (C, H*W) layout.

    The 3x3 stencil is one (9*Cout, Cin)@(Cin, HW) MXU matmul followed by nine
    lane-axis rolls (shift = -((dh-1)*W + (dw-1))) with 0/1 edge masks that
    implement the zero padding; wrap-around lanes from the circular roll are
    always masked positions, so the roll+mask is exactly the padded conv.
    """
    hw = xc.shape[1]
    cout = wstack_ref.shape[0] // 9
    cg = cout // 8                        # GroupNorm(num_groups=8, cout)

    # --- Conv2d(Cin, Cout, k=3, s=1, p=1) ------------------------------------
    v = jnp.dot(wstack_ref[...], xc, preferred_element_type=jnp.float32)    # (9*Cout, HW)
    terms = []
    for t in range(9):
        dh, dw = divmod(t, 3)
        off = (dh - 1) * width + (dw - 1)
        vt = v[t * cout:(t + 1) * cout, :]
        if off != 0:                       # off == 0 only for the center tap
            vt = pltpu.roll(vt, shift=(-off) % hw, axis=1)
            vt = vt * mask_ref[t:t + 1, :]          # zero padding baked into the mask
        terms.append(vt)
    y = _tree_sum(terms) + b_ref[...]                                       # (Cout, HW)

    # --- GroupNorm(8, Cout), biased variance, eps=1e-5, per sample -----------
    inv_hw = 1.0 / hw
    if cg == 1:
        # group size 1 (Cout == num_groups): plain per-channel stats
        mean_c = jnp.sum(y, axis=1, keepdims=True) * inv_hw
        cen = y - mean_c
        var_c = jnp.sum(cen * cen, axis=1, keepdims=True) * inv_hw
    else:
        # group mixing via a tiny lane-dense (Cout,Cout)@(Cout,HW) matmul
        gmix = gmix_ref[...]
        mean_c = jnp.sum(jnp.dot(gmix, y, preferred_element_type=jnp.float32),
                         axis=1, keepdims=True) * inv_hw
        cen = y - mean_c
        var_c = jnp.sum(jnp.dot(gmix, cen * cen, preferred_element_type=jnp.float32),
                        axis=1, keepdims=True) * inv_hw
    yn = cen * jax.lax.rsqrt(var_c + 1e-5) * gamma_ref[...] + beta_ref[...]

    # --- GELU (exact, erf form) -----------------------------------------------
    return _gelu_exact(yn)


def _make_decoder_kernel(width1, width2):
    """Kernel factory: closes over the (static) spatial widths of the two levels."""

    def decoder_kernel(x_ref,
                       m1_ref, w1_ref, b1_ref, g1_ref, be1_ref, gm1_ref, at1_ref,
                       m2_ref, w2_ref, b2_ref, g2_ref, be2_ref, at2_ref,
                       wf_ref, bf_ref,
                       out_ref):
        # ---- level 1: conv3x3 + GN(8) + GELU, then bilinear x2 (lane-dense matmul)
        yg1 = _conv_gn_gelu(x_ref[...], m1_ref, w1_ref, b1_ref, g1_ref, be1_ref,
                            gm1_ref, width1)                                 # (C1, HW1)
        z1 = jnp.dot(yg1, at1_ref[...].astype(jnp.float32),
                     preferred_element_type=jnp.float32)                     # (C1, HW2)
        # ---- level 2: conv3x3 + GN(8) + GELU (group size 1 -> per-channel stats)
        yg2 = _conv_gn_gelu(z1, m2_ref, w2_ref, b2_ref, g2_ref, be2_ref,
                            None, width2)                                    # (C2, HW2)
        # ---- final 1x1 conv commuted in front of the last resize (both linear):
        #      wf @ (yg2 @ at2)  ==  (wf @ yg2) @ at2
        r = jnp.dot(wf_ref[...], yg2, preferred_element_type=jnp.float32)    # (1, HW2)
        logit = jnp.dot(r, at2_ref[...].astype(jnp.float32),
                        preferred_element_type=jnp.float32) + bf_ref[...]    # (1, HW3)
        out_ref[...] = jax.nn.sigmoid(logit)

    return decoder_kernel


# ----------------------------------------------------------------------------
# Host-side constant builders (built once per shape, cached)
# ----------------------------------------------------------------------------
def bilinear_matrix(out_size, in_size):
    """Row matrix of F.interpolate(mode='bilinear', align_corners=False)."""
    m = np.zeros((out_size, in_size), dtype=np.float32)
    scale = in_size / out_size
    for o in range(out_size):
        src = (o + 0.5) * scale - 0.5
        src = max(src, 0.0)                  # PyTorch clamps negative source coords
        i0 = min(int(np.floor(src)), in_size - 1)
        i1 = min(i0 + 1, in_size - 1)
        frac = src - i0
        m[o, i0] += 1.0 - frac
        m[o, i1] += frac
    return m


@functools.lru_cache(maxsize=None)
def _level_consts(h, w, hout, wout):
    """Cached per-level constants.

    mask (9, HW) f32: 0/1 per-position validity of conv tap t = dh*3+dw
                      (implements the 3x3 conv zero padding for the roll path).
    at   (HW, HoWo) bf16: transposed kron(Mh, Mw) bilinear-resize matrix for the
                      (C, H*W) layout (stored bf16 to halve constant HBM traffic).
    """
    hw = h * w
    mask = np.zeros((9, hw), dtype=np.float32)
    for dh in range(3):
        for dw in range(3):
            t = dh * 3 + dw
            for ph in range(h):
                for pw in range(w):
                    if 0 <= ph + dh - 1 < h and 0 <= pw + dw - 1 < w:
                        mask[t, ph * w + pw] = 1.0
    at = np.kron(bilinear_matrix(hout, h), bilinear_matrix(wout, w)).T.astype(np.float32)
    return jnp.asarray(mask), jnp.asarray(at, dtype=jnp.bfloat16)


@functools.lru_cache(maxsize=None)
def _group_mix(channels, num_groups):
    """(C, C) matrix averaging over channels belonging to the same GN group."""
    cg = max(channels // num_groups, 1)
    g = np.zeros((channels, channels), dtype=np.float32)
    for i in range(channels):
        gi = i // cg
        g[i, gi * cg:(gi + 1) * cg] = 1.0 / cg
    return jnp.asarray(g)


# ----------------------------------------------------------------------------
# Forward wrapper (single fused pallas_call, jitted)
# ----------------------------------------------------------------------------
@functools.partial(jax.jit, static_argnums=(2,))
def density_decoder_forward(x_nchw, params, target_hw):
    """DensityDecoder.forward (use_hiearachy=False => n_levels=2)."""
    n, c0, h1, w1 = x_nchw.shape
    (cw1, cb1, gam1, bet1), (cw2, cb2, gam2, bet2) = params["levels"]
    wf, bf = params["final"]
    c1, c2 = cw1.shape[-1], cw2.shape[-1]
    h2, w2 = 2 * h1, 2 * w1                  # level 1: scale_factor=2
    hw1, hw2, hw3 = h1 * w1, h2 * w2, target_hw * target_hw

    m1, at1 = _level_consts(h1, w1, h2, w2)
    m2, at2 = _level_consts(h2, w2, target_hw, target_hw)
    gmix1 = _group_mix(c1, 8)                # level 2 (cg==1) needs no group mix

    # HWIO conv weights -> (9*Cout, Cin) weight stacks matching the tap order.
    w1s = jnp.transpose(cw1, (0, 1, 3, 2)).reshape(9 * c1, c0)
    w2s = jnp.transpose(cw2, (0, 1, 3, 2)).reshape(9 * c2, c1)

    kernel = _make_decoder_kernel(w1, w2)

    out = pl.pallas_call(
        kernel,
        out_shape=jax.ShapeDtypeStruct((n, 1, hw3), jnp.float32),
        grid=(n,),
        in_specs=[
            pl.BlockSpec((None, c0, hw1), lambda i: (i, 0, 0)),   # x (per sample)
            pl.BlockSpec((9, hw1), lambda i: (0, 0)),             # conv1 edge masks
            pl.BlockSpec((9 * c1, c0), lambda i: (0, 0)),         # conv1 weight stack
            pl.BlockSpec((c1, 1), lambda i: (0, 0)),              # conv1 bias
            pl.BlockSpec((c1, 1), lambda i: (0, 0)),              # gn1 gamma
            pl.BlockSpec((c1, 1), lambda i: (0, 0)),              # gn1 beta
            pl.BlockSpec((c1, c1), lambda i: (0, 0)),             # gn1 group mix
            pl.BlockSpec((hw1, hw2), lambda i: (0, 0)),           # resize 1 (bf16)
            pl.BlockSpec((9, hw2), lambda i: (0, 0)),             # conv2 edge masks
            pl.BlockSpec((9 * c2, c1), lambda i: (0, 0)),         # conv2 weight stack
            pl.BlockSpec((c2, 1), lambda i: (0, 0)),              # conv2 bias
            pl.BlockSpec((c2, 1), lambda i: (0, 0)),              # gn2 gamma
            pl.BlockSpec((c2, 1), lambda i: (0, 0)),              # gn2 beta
            pl.BlockSpec((hw2, hw3), lambda i: (0, 0)),           # resize 2 (bf16)
            pl.BlockSpec((1, c2), lambda i: (0, 0)),              # final_conv weight
            pl.BlockSpec((1, 1), lambda i: (0, 0)),               # final_conv bias
        ],
        out_specs=pl.BlockSpec((None, 1, hw3), lambda i: (i, 0, 0)),
        compiler_params=pltpu.CompilerParams(
            dimension_semantics=("parallel",)),      # N=2 -> both TCs on v7x
    )(x_nchw.reshape(n, c0, hw1),
      m1, w1s, cb1.reshape(c1, 1), gam1.reshape(c1, 1), bet1.reshape(c1, 1), gmix1, at1,
      m2, w2s, cb2.reshape(c2, 1), gam2.reshape(c2, 1), bet2.reshape(c2, 1), at2,
      wf.reshape(1, c2), bf.reshape(1, 1))
    return out.reshape(n, target_hw, target_hw)      # 'n 1 h w -> n h w'


# ----------------------------------------------------------------------------
# Deterministic parameter init (shapes from DensityDecoder.__init__)
# ----------------------------------------------------------------------------
def init_params(key, in_dim):
    params = {"levels": [], "final": None}
    keys = jax.random.split(key, 16)
    ki = 0
    crt = in_dim
    for _ in range(2):                               # n_levels = 2
        cout = crt // 2
        fan_in, fan_out = crt * 9, cout * 9
        std = math.sqrt(2.0 / (fan_in + fan_out))    # xavier_normal_
        w = std * jax.random.normal(keys[ki], (3, 3, crt, cout), jnp.float32); ki += 1
        bound = 1.0 / math.sqrt(fan_in)
        b = jax.random.uniform(keys[ki], (cout,), jnp.float32, -bound, bound); ki += 1
        # GroupNorm default init is ones/zeros; perturb deterministically to
        # exercise the affine path.
        gamma = 1.0 + 0.1 * jax.random.normal(keys[ki], (cout,), jnp.float32); ki += 1
        beta = 0.1 * jax.random.normal(keys[ki], (cout,), jnp.float32); ki += 1
        params["levels"].append((w, b, gamma, beta))
        crt = cout
    bound = 1.0 / math.sqrt(crt)
    wf = jax.random.uniform(keys[ki], (1, crt), jnp.float32, -bound, bound); ki += 1
    bf = jax.random.uniform(keys[ki], (1, 1), jnp.float32, -bound, bound); ki += 1
    params["final"] = (wf, bf)
    return params


# ----------------------------------------------------------------------------
# Pure-JAX reference (same semantics as the PyTorch forward) for validation
# ----------------------------------------------------------------------------
# TODO(synk): the reference shares bilinear_matrix with the kernel, so PyTorch
# F.interpolate(align_corners=False) edge semantics are not independently
# cross-checked against torch here (torch unavailable in this environment).
def reference_forward(x_nchw, params, target_hw):
    hi = jax.lax.Precision.HIGHEST
    x = x_nchw
    n_levels = 2
    for i in range(n_levels):
        w, b, gamma, beta = params["levels"][i]      # w is HWIO
        x = jax.lax.conv_general_dilated(
            x, w, window_strides=(1, 1), padding=((1, 1), (1, 1)),
            dimension_numbers=("NCHW", "HWIO", "NCHW"), precision=hi)
        x = x + b[None, :, None, None]
        n, c, h, wd = x.shape
        xg = x.reshape(n, 8, c // 8, h, wd)
        mean = xg.mean(axis=(2, 3, 4), keepdims=True)
        var = ((xg - mean) ** 2).mean(axis=(2, 3, 4), keepdims=True)
        xg = (xg - mean) / jnp.sqrt(var + 1e-5)
        x = xg.reshape(n, c, h, wd) * gamma[None, :, None, None] + beta[None, :, None, None]
        x = jax.nn.gelu(x, approximate=False)
        hout = 2 * h if i < n_levels - 1 else target_hw
        wout = 2 * wd if i < n_levels - 1 else target_hw
        mh = jnp.asarray(bilinear_matrix(hout, h))
        mw = jnp.asarray(bilinear_matrix(wout, wd))
        x = jnp.einsum("oh,nchw->ncow", mh, x, precision=hi)
        x = jnp.einsum("pw,ncow->ncop", mw, x, precision=hi)
    wf, bf = params["final"]
    x = jnp.einsum("nchw,c->nhw", x, wf[0], precision=hi) + bf[0, 0]
    return jax.nn.sigmoid(x)


# ----------------------------------------------------------------------------
if __name__ == "__main__":
    key = jax.random.PRNGKey(0)
    kx, kp = jax.random.split(key)

    # DensityDecoder(in_dim=32, target_hw=24): 8x8 feature map -> 16x16 -> 24x24
    N, C, Hin, Win, target_hw = 2, 32, 8, 8, 24
    x = jax.random.normal(kx, (N, C, Hin, Win), jnp.float32)   # NCHW, like PyTorch
    params = init_params(kp, C)

    out = jax.block_until_ready(density_decoder_forward(x, params, target_hw))
    assert out.shape == (N, target_hw, target_hw), out.shape

    ref = jax.block_until_ready(reference_forward(x, params, target_hw))
    # bf16 resize constants contribute ~1e-3-level error on the pre-sigmoid logit
    # (sigmoid' <= 0.25 compresses it further), well inside 5e-3.
    np.testing.assert_allclose(np.asarray(out), np.asarray(ref), rtol=5e-3, atol=5e-3)

    print("KERNEL_OK")
</pallas_src>

<mosaic_0001>
module attributes {stable_mosaic.version = 11 : i64} {
  func.func @decoder_kernel(%arg0: i32, %arg1: memref<1x32x64xf32, #tpu.memory_space<vmem>>, %arg2: memref<9x64xf32, #tpu.memory_space<vmem>>, %arg3: memref<144x32xf32, #tpu.memory_space<vmem>>, %arg4: memref<16x1xf32, #tpu.memory_space<vmem>>, %arg5: memref<16x1xf32, #tpu.memory_space<vmem>>, %arg6: memref<16x1xf32, #tpu.memory_space<vmem>>, %arg7: memref<16x16xf32, #tpu.memory_space<vmem>>, %arg8: memref<64x256xbf16, #tpu.memory_space<vmem>>, %arg9: memref<9x256xf32, #tpu.memory_space<vmem>>, %arg10: memref<72x16xf32, #tpu.memory_space<vmem>>, %arg11: memref<8x1xf32, #tpu.memory_space<vmem>>, %arg12: memref<8x1xf32, #tpu.memory_space<vmem>>, %arg13: memref<8x1xf32, #tpu.memory_space<vmem>>, %arg14: memref<256x576xbf16, #tpu.memory_space<vmem>>, %arg15: memref<1x8xf32, #tpu.memory_space<vmem>>, %arg16: memref<1x1xf32, #tpu.memory_space<vmem>>, %arg17: memref<1x1x576xf32, #tpu.memory_space<vmem>>) attributes {dimension_semantics = [#tpu.dimension_semantics<parallel>], iteration_bounds = array<i64: 2>, scalar_prefetch = 0 : i64, scratch_operands = 0 : i64, tpu.core_type = #tpu.core_type<tc>, window_params = [{transform_indices = @transform_0, window_bounds = array<i64: 1, 32, 64>}, {pipeline_mode = #tpu.pipeline_mode<synchronous>, transform_indices = @transform_1, window_bounds = array<i64: 9, 64>}, {pipeline_mode = #tpu.pipeline_mode<synchronous>, transform_indices = @transform_2, window_bounds = array<i64: 144, 32>}, {pipeline_mode = #tpu.pipeline_mode<synchronous>, transform_indices = @transform_3, window_bounds = array<i64: 16, 1>}, {pipeline_mode = #tpu.pipeline_mode<synchronous>, transform_indices = @transform_4, window_bounds = array<i64: 16, 1>}, {pipeline_mode = #tpu.pipeline_mode<synchronous>, transform_indices = @transform_5, window_bounds = array<i64: 16, 1>}, {pipeline_mode = #tpu.pipeline_mode<synchronous>, transform_indices = @transform_6, window_bounds = array<i64: 16, 16>}, {pipeline_mode = #tpu.pipeline_mode<synchronous>, transform_indices = @transform_7, window_bounds = array<i64: 64, 256>}, {pipeline_mode = #tpu.pipeline_mode<synchronous>, transform_indices = @transform_8, window_bounds = array<i64: 9, 256>}, {pipeline_mode = #tpu.pipeline_mode<synchronous>, transform_indices = @transform_9, window_bounds = array<i64: 72, 16>}, {pipeline_mode = #tpu.pipeline_mode<synchronous>, transform_indices = @transform_10, window_bounds = array<i64: 8, 1>}, {pipeline_mode = #tpu.pipeline_mode<synchronous>, transform_indices = @transform_11, window_bounds = array<i64: 8, 1>}, {pipeline_mode = #tpu.pipeline_mode<synchronous>, transform_indices = @transform_12, window_bounds = array<i64: 8, 1>}, {pipeline_mode = #tpu.pipeline_mode<synchronous>, transform_indices = @transform_13, window_bounds = array<i64: 256, 576>}, {pipeline_mode = #tpu.pipeline_mode<synchronous>, transform_indices = @transform_14, window_bounds = array<i64: 1, 8>}, {pipeline_mode = #tpu.pipeline_mode<synchronous>, transform_indices = @transform_15, window_bounds = array<i64: 1, 1>}, {transform_indices = @transform_16, window_bounds = array<i64: 1, 1, 576>}]} {
    %c0 = arith.constant 0 : index
    %c0_0 = arith.constant 0 : index
    %c0_1 = arith.constant 0 : index
    %0 = vector.load %arg1[%c0, %c0_0, %c0_1] : memref<1x32x64xf32, #tpu.memory_space<vmem>>, vector<1x32x64xf32>
    %1 = vector.shape_cast %0 : vector<1x32x64xf32> to vector<32x64xf32>
    %c0_2 = arith.constant 0 : index
    %c0_3 = arith.constant 0 : index
    %2 = vector.load %arg3[%c0_2, %c0_3] : memref<144x32xf32, #tpu.memory_space<vmem>>, vector<144x32xf32>
    %cst = arith.constant dense<0.000000e+00> : vector<144x64xf32>
    %3 = tpu.matmul %2, %1, %cst {dimension_numbers = #tpu.dot_dimension_numbers<[1], [0], [0], [1], [0, 0, 1, 1], [], []>} : vector<144x32xf32>, vector<32x64xf32>, vector<144x64xf32> -> vector<144x64xf32>
    %4 = vector.extract_strided_slice %3 {offsets = [0, 0], sizes = [16, 64], strides = [1, 1]} : vector<144x64xf32> to vector<16x64xf32>
    %c9_i32 = arith.constant 9 : i32
    %5 = tpu.dynamic_rotate %4 by %c9_i32 dim 1 : vector<16x64xf32>, i32 -> vector<16x64xf32>
    %c0_4 = arith.constant 0 : index
    %c0_5 = arith.constant 0 : index
    %6 = vector.load %arg2[%c0_4, %c0_5] : memref<9x64xf32, #tpu.memory_space<vmem>>, vector<1x64xf32>
    %7 = vector.broadcast %6 : vector<1x64xf32> to vector<16x64xf32>
    %8 = arith.mulf %5, %7 : vector<16x64xf32>
    %9 = vector.extract_strided_slice %3 {offsets = [16, 0], sizes = [16, 64], strides = [1, 1]} : vector<144x64xf32> to vector<16x64xf32>
    %c8_i32 = arith.constant 8 : i32
    %10 = tpu.dynamic_rotate %9 by %c8_i32 dim 1 : vector<16x64xf32>, i32 -> vector<16x64xf32>
    %c1 = arith.constant 1 : index
    %c0_6 = arith.constant 0 : index
    %11 = vector.load %arg2[%c1, %c0_6] : memref<9x64xf32, #tpu.memory_space<vmem>>, vector<1x64xf32>
    %12 = vector.broadcast %11 : vector<1x64xf32> to vector<16x64xf32>
    %13 = arith.mulf %10, %12 : vector<16x64xf32>
    %14 = vector.extract_strided_slice %3 {offsets = [32, 0], sizes = [16, 64], strides = [1, 1]} : vector<144x64xf32> to vector<16x64xf32>
    %c7_i32 = arith.constant 7 : i32
    %15 = tpu.dynamic_rotate %14 by %c7_i32 dim 1 : vector<16x64xf32>, i32 -> vector<16x64xf32>
    %c2 = arith.constant 2 : index
    %c0_7 = arith.constant 0 : index
    %16 = vector.load %arg2[%c2, %c0_7] : memref<9x64xf32, #tpu.memory_space<vmem>>, vector<1x64xf32>
    %17 = vector.broadcast %16 : vector<1x64xf32> to vector<16x64xf32>
    %18 = arith.mulf %15, %17 : vector<16x64xf32>
    %19 = vector.extract_strided_slice %3 {offsets = [48, 0], sizes = [16, 64], strides = [1, 1]} : vector<144x64xf32> to vector<16x64xf32>
    %c1_i32 = arith.constant 1 : i32
    %20 = tpu.dynamic_rotate %19 by %c1_i32 dim 1 : vector<16x64xf32>, i32 -> vector<16x64xf32>
    %c3 = arith.constant 3 : index
    %c0_8 = arith.constant 0 : index
    %21 = vector.load %arg2[%c3, %c0_8] : memref<9x64xf32, #tpu.memory_space<vmem>>, vector<1x64xf32>
    %22 = vector.broadcast %21 : vector<1x64xf32> to vector<16x64xf32>
    %23 = arith.mulf %20, %22 : vector<16x64xf32>
    %24 = vector.extract_strided_slice %3 {offsets = [64, 0], sizes = [16, 64], strides = [1, 1]} : vector<144x64xf32> to vector<16x64xf32>
    %25 = vector.extract_strided_slice %3 {offsets = [80, 0], sizes = [16, 64], strides = [1, 1]} : vector<144x64xf32> to vector<16x64xf32>
    %c63_i32 = arith.constant 63 : i32
    %26 = tpu.dynamic_rotate %25 by %c63_i32 dim 1 : vector<16x64xf32>, i32 -> vector<16x64xf32>
    %c5 = arith.constant 5 : index
    %c0_9 = arith.constant 0 : index
    %27 = vector.load %arg2[%c5, %c0_9] : memref<9x64xf32, #tpu.memory_space<vmem>>, vector<1x64xf32>
    %28 = vector.broadcast %27 : vector<1x64xf32> to vector<16x64xf32>
    %29 = arith.mulf %26, %28 : vector<16x64xf32>
    %30 = vector.extract_strided_slice %3 {offsets = [96, 0], sizes = [16, 64], strides = [1, 1]} : vector<144x64xf32> to vector<16x64xf32>
    %c57_i32 = arith.constant 57 : i32
    %31 = tpu.dynamic_rotate %30 by %c57_i32 dim 1 : vector<16x64xf32>, i32 -> vector<16x64xf32>
    %c6 = arith.constant 6 : index
    %c0_10 = arith.constant 0 : index
    %32 = vector.load %arg2[%c6, %c0_10] : memref<9x64xf32, #tpu.memory_space<vmem>>, vector<1x64xf32>
    %33 = vector.broadcast %32 : vector<1x64xf32> to vector<16x64xf32>
    %34 = arith.mulf %31, %33 : vector<16x64xf32>
    %35 = vector.extract_strided_slice %3 {offsets = [112, 0], sizes = [16, 64], strides = [1, 1]} : vector<144x64xf32> to vector<16x64xf32>
    %c56_i32 = arith.constant 56 : i32
    %36 = tpu.dynamic_rotate %35 by %c56_i32 dim 1 : vector<16x64xf32>, i32 -> vector<16x64xf32>
    %c7 = arith.constant 7 : index
    %c0_11 = arith.constant 0 : index
    %37 = vector.load %arg2[%c7, %c0_11] : memref<9x64xf32, #tpu.memory_space<vmem>>, vector<1x64xf32>
    %38 = vector.broadcast %37 : vector<1x64xf32> to vector<16x64xf32>
    %39 = arith.mulf %36, %38 : vector<16x64xf32>
    %40 = vector.extract_strided_slice %3 {offsets = [128, 0], sizes = [16, 64], strides = [1, 1]} : vector<144x64xf32> to vector<16x64xf32>
    %c55_i32 = arith.constant 55 : i32
    %41 = tpu.dynamic_rotate %40 by %c55_i32 dim 1 : vector<16x64xf32>, i32 -> vector<16x64xf32>
    %c8 = arith.constant 8 : index
    %c0_12 = arith.constant 0 : index
    %42 = vector.load %arg2[%c8, %c0_12] : memref<9x64xf32, #tpu.memory_space<vmem>>, vector<1x64xf32>
    %43 = vector.broadcast %42 : vector<1x64xf32> to vector<16x64xf32>
    %44 = arith.mulf %41, %43 : vector<16x64xf32>
    %45 = arith.addf %8, %13 : vector<16x64xf32>
    %46 = arith.addf %18, %23 : vector<16x64xf32>
    %47 = arith.addf %24, %29 : vector<16x64xf32>
    %48 = arith.addf %34, %39 : vector<16x64xf32>
    %49 = arith.addf %45, %46 : vector<16x64xf32>
    %50 = arith.addf %47, %48 : vector<16x64xf32>
    %51 = arith.addf %49, %50 : vector<16x64xf32>
    %52 = arith.addf %51, %44 : vector<16x64xf32>
    %c0_13 = arith.constant 0 : index
    %c0_14 = arith.constant 0 : index
    %53 = vector.load %arg4[%c0_13, %c0_14] : memref<16x1xf32, #tpu.memory_space<vmem>>, vector<16x1xf32>
    %54 = vector.broadcast %53 : vector<16x1xf32> to vector<16x64xf32>
    %55 = arith.addf %52, %54 : vector<16x64xf32>
    %c0_15 = arith.constant 0 : index
    %c0_16 = arith.constant 0 : index
    %56 = vector.load %arg7[%c0_15, %c0_16] : memref<16x16xf32, #tpu.memory_space<vmem>>, vector<16x16xf32>
    %cst_17 = arith.constant dense<0.000000e+00> : vector<16x64xf32>
    %57 = tpu.matmul %56, %55, %cst_17 {dimension_numbers = #tpu.dot_dimension_numbers<[1], [0], [0], [1], [0, 0, 1, 1], [], []>} : vector<16x16xf32>, vector<16x64xf32>, vector<16x64xf32> -> vector<16x64xf32>
    %cst_18 = arith.constant dense<0.000000e+00> : vector<16xf32>
    %58 = vector.multi_reduction <add>, %57, %cst_18 [1] : vector<16x64xf32> to vector<16xf32>
    %59 = vector.shape_cast %58 : vector<16xf32> to vector<16x1xf32>
    %cst_19 = arith.constant 1.562500e-02 : f32
    %60 = vector.broadcast %cst_19 : f32 to vector<16x1xf32>
    %61 = arith.mulf %59, %60 : vector<16x1xf32>
    %62 = vector.broadcast %61 : vector<16x1xf32> to vector<16x64xf32>
    %63 = arith.subf %55, %62 : vector<16x64xf32>
    %64 = arith.mulf %63, %63 : vector<16x64xf32>
    %cst_20 = arith.constant dense<0.000000e+00> : vector<16x64xf32>
    %65 = tpu.matmul %56, %64, %cst_20 {dimension_numbers = #tpu.dot_dimension_numbers<[1], [0], [0], [1], [0, 0, 1, 1], [], []>} : vector<16x16xf32>, vector<16x64xf32>, vector<16x64xf32> -> vector<16x64xf32>
    %cst_21 = arith.constant dense<0.000000e+00> : vector<16xf32>
    %66 = vector.multi_reduction <add>, %65, %cst_21 [1] : vector<16x64xf32> to vector<16xf32>
    %67 = vector.shape_cast %66 : vector<16xf32> to vector<16x1xf32>
    %cst_22 = arith.constant 1.562500e-02 : f32
    %68 = vector.broadcast %cst_22 : f32 to vector<16x1xf32>
    %69 = arith.mulf %67, %68 : vector<16x1xf32>
    %cst_23 = arith.constant 9.99999974E-6 : f32
    %70 = vector.broadcast %cst_23 : f32 to vector<16x1xf32>
    %71 = arith.addf %69, %70 : vector<16x1xf32>
    %72 = math.rsqrt %71 : vector<16x1xf32>
    %73 = vector.broadcast %72 : vector<16x1xf32> to vector<16x64xf32>
    %74 = arith.mulf %63, %73 : vector<16x64xf32>
    %c0_24 = arith.constant 0 : index
    %c0_25 = arith.constant 0 : index
    %75 = vector.load %arg5[%c0_24, %c0_25] : memref<16x1xf32, #tpu.memory_space<vmem>>, vector<16x1xf32>
    %76 = vector.broadcast %75 : vector<16x1xf32> to vector<16x64xf32>
    %77 = arith.mulf %74, %76 : vector<16x64xf32>
    %c0_26 = arith.constant 0 : index
    %c0_27 = arith.constant 0 : index
    %78 = vector.load %arg6[%c0_26, %c0_27] : memref<16x1xf32, #tpu.memory_space<vmem>>, vector<16x1xf32>
    %79 = vector.broadcast %78 : vector<16x1xf32> to vector<16x64xf32>
    %80 = arith.addf %77, %79 : vector<16x64xf32>
    %cst_28 = arith.constant 5.000000e-01 : f32
    %81 = vector.broadcast %cst_28 : f32 to vector<16x64xf32>
    %82 = arith.mulf %81, %80 : vector<16x64xf32>
    %cst_29 = arith.constant 1.41421354 : f32
    %83 = vector.broadcast %cst_29 : f32 to vector<16x64xf32>
    %84 = arith.divf %80, %83 : vector<16x64xf32>
    %cst_30 = arith.constant 0.000000e+00 : f32
    %85 = vector.broadcast %cst_30 : f32 to vector<16x64xf32>
    %86 = arith.cmpf oge, %84, %85 : vector<16x64xf32>
    %cst_31 = arith.constant 1.000000e+00 : f32
    %cst_32 = arith.constant -1.000000e+00 : f32
    %87 = vector.broadcast %cst_31 : f32 to vector<16x64xf32>
    %88 = vector.broadcast %cst_32 : f32 to vector<16x64xf32>
    %89 = arith.select %86, %87, %88 : vector<16x64xi1>, vector<16x64xf32>
    %90 = math.absf %84 : vector<16x64xf32>
    %cst_33 = arith.constant 0.327591091 : f32
    %91 = vector.broadcast %cst_33 : f32 to vector<16x64xf32>
    %92 = arith.mulf %91, %90 : vector<16x64xf32>
    %cst_34 = arith.constant 1.000000e+00 : f32
    %93 = vector.broadcast %cst_34 : f32 to vector<16x64xf32>
    %94 = arith.addf %93, %92 : vector<16x64xf32>
    %cst_35 = arith.constant 1.000000e+00 : f32
    %95 = vector.broadcast %cst_35 : f32 to vector<16x64xf32>
    %96 = arith.divf %95, %94 : vector<16x64xf32>
    %cst_36 = arith.constant 1.06140542 : f32
    %97 = vector.broadcast %cst_36 : f32 to vector<16x64xf32>
    %98 = arith.mulf %97, %96 : vector<16x64xf32>
    %cst_37 = arith.constant -1.45315206 : f32
    %99 = vector.broadcast %cst_37 : f32 to vector<16x64xf32>
    %100 = arith.addf %98, %99 : vector<16x64xf32>
    %101 = arith.mulf %100, %96 : vector<16x64xf32>
    %cst_38 = arith.constant 1.42141378 : f32
    %102 = vector.broadcast %cst_38 : f32 to vector<16x64xf32>
    %103 = arith.addf %101, %102 : vector<16x64xf32>
    %104 = arith.mulf %103, %96 : vector<16x64xf32>
    %cst_39 = arith.constant -0.284496725 : f32
    %105 = vector.broadcast %cst_39 : f32 to vector<16x64xf32>
    %106 = arith.addf %104, %105 : vector<16x64xf32>
    %107 = arith.mulf %106, %96 : vector<16x64xf32>
    %cst_40 = arith.constant 0.254829586 : f32
    %108 = vector.broadcast %cst_40 : f32 to vector<16x64xf32>
    %109 = arith.addf %107, %108 : vector<16x64xf32>
    %110 = arith.mulf %109, %96 : vector<16x64xf32>
    %cst_41 = arith.constant 0.000000e+00 : f32
    %111 = vector.broadcast %cst_41 : f32 to vector<16x64xf32>
    %112 = arith.subf %111, %90 : vector<16x64xf32>
    %113 = arith.mulf %112, %90 : vector<16x64xf32>
    %114 = math.exp %113 : vector<16x64xf32>
    %115 = arith.mulf %110, %114 : vector<16x64xf32>
    %cst_42 = arith.constant 1.000000e+00 : f32
    %116 = vector.broadcast %cst_42 : f32 to vector<16x64xf32>
    %117 = arith.subf %116, %115 : vector<16x64xf32>
    %118 = arith.mulf %89, %117 : vector<16x64xf32>
    %cst_43 = arith.constant 1.000000e+00 : f32
    %119 = vector.broadcast %cst_43 : f32 to vector<16x64xf32>
    %120 = arith.addf %119, %118 : vector<16x64xf32>
    %121 = arith.mulf %82, %120 : vector<16x64xf32>
    %c0_44 = arith.constant 0 : index
    %c0_45 = arith.constant 0 : index
    %122 = vector.load %arg8[%c0_44, %c0_45] : memref<64x256xbf16, #tpu.memory_space<vmem>>, vector<64x256xbf16>
    %123 = arith.extf %122 : vector<64x256xbf16> to vector<64x256xf32>
    %cst_46 = arith.constant dense<0.000000e+00> : vector<16x256xf32>
    %124 = tpu.matmul %121, %123, %cst_46 {dimension_numbers = #tpu.dot_dimension_numbers<[1], [0], [0], [1], [0, 0, 1, 1], [], []>} : vector<16x64xf32>, vector<64x256xf32>, vector<16x256xf32> -> vector<16x256xf32>
    %c0_47 = arith.constant 0 : index
    %c0_48 = arith.constant 0 : index
    %125 = vector.load %arg10[%c0_47, %c0_48] : memref<72x16xf32, #tpu.memory_space<vmem>>, vector<72x16xf32>
    %cst_49 = arith.constant dense<0.000000e+00> : vector<72x256xf32>
    %126 = tpu.matmul %125, %124, %cst_49 {dimension_numbers = #tpu.dot_dimension_numbers<[1], [0], [0], [1], [0, 0, 1, 1], [], []>} : vector<72x16xf32>, vector<16x256xf32>, vector<72x256xf32> -> vector<72x256xf32>
    %127 = vector.extract_strided_slice %126 {offsets = [0, 0], sizes = [8, 256], strides = [1, 1]} : vector<72x256xf32> to vector<8x256xf32>
    %c17_i32 = arith.constant 17 : i32
    %128 = tpu.dynamic_rotate %127 by %c17_i32 dim 1 : vector<8x256xf32>, i32 -> vector<8x256xf32>
    %c0_50 = arith.constant 0 : index
    %c0_51 = arith.constant 0 : index
    %129 = vector.load %arg9[%c0_50, %c0_51] : memref<9x256xf32, #tpu.memory_space<vmem>>, vector<1x256xf32>
    %130 = vector.broadcast %129 : vector<1x256xf32> to vector<8x256xf32>
    %131 = arith.mulf %128, %130 : vector<8x256xf32>
    %132 = vector.extract_strided_slice %126 {offsets = [8, 0], sizes = [8, 256], strides = [1, 1]} : vector<72x256xf32> to vector<8x256xf32>
    %c16_i32 = arith.constant 16 : i32
    %133 = tpu.dynamic_rotate %132 by %c16_i32 dim 1 : vector<8x256xf32>, i32 -> vector<8x256xf32>
    %c1_52 = arith.constant 1 : index
    %c0_53 = arith.constant 0 : index
    %134 = vector.load %arg9[%c1_52, %c0_53] : memref<9x256xf32, #tpu.memory_space<vmem>>, vector<1x256xf32>
    %135 = vector.broadcast %134 : vector<1x256xf32> to vector<8x256xf32>
    %136 = arith.mulf %133, %135 : vector<8x256xf32>
    %137 = vector.extract_strided_slice %126 {offsets = [16, 0], sizes = [8, 256], strides = [1, 1]} : vector<72x256xf32> to vector<8x256xf32>
    %c15_i32 = arith.constant 15 : i32
    %138 = tpu.dynamic_rotate %137 by %c15_i32 dim 1 : vector<8x256xf32>, i32 -> vector<8x256xf32>
    %c2_54 = arith.constant 2 : index
    %c0_55 = arith.constant 0 : index
    %139 = vector.load %arg9[%c2_54, %c0_55] : memref<9x256xf32, #tpu.memory_space<vmem>>, vector<1x256xf32>
    %140 = vector.broadcast %139 : vector<1x256xf32> to vector<8x256xf32>
    %141 = arith.mulf %138, %140 : vector<8x256xf32>
    %142 = vector.extract_strided_slice %126 {offsets = [24, 0], sizes = [8, 256], strides = [1, 1]} : vector<72x256xf32> to vector<8x256xf32>
    %c1_i32_56 = arith.constant 1 : i32
    %143 = tpu.dynamic_rotate %142 by %c1_i32_56 dim 1 : vector<8x256xf32>, i32 -> vector<8x256xf32>
    %c3_57 = arith.constant 3 : index
    %c0_58 = arith.constant 0 : index
    %144 = vector.load %arg9[%c3_57, %c0_58] : memref<9x256xf32, #tpu.memory_space<vmem>>, vector<1x256xf32>
    %145 = vector.broadcast %144 : vector<1x256xf32> to vector<8x256xf32>
    %146 = arith.mulf %143, %145 : vector<8x256xf32>
    %147 = vector.extract_strided_slice %126 {offsets = [32, 0], sizes = [8, 256], strides = [1, 1]} : vector<72x256xf32> to vector<8x256xf32>
    %148 = vector.extract_strided_slice %126 {offsets = [40, 0], sizes = [8, 256], strides = [1, 1]} : vector<72x256xf32> to vector<8x256xf32>
    %c255_i32 = arith.constant 255 : i32
    %149 = tpu.dynamic_rotate %148 by %c255_i32 dim 1 : vector<8x256xf32>, i32 -> vector<8x256xf32>
    %c5_59 = arith.constant 5 : index
    %c0_60 = arith.constant 0 : index
    %150 = vector.load %arg9[%c5_59, %c0_60] : memref<9x256xf32, #tpu.memory_space<vmem>>, vector<1x256xf32>
    %151 = vector.broadcast %150 : vector<1x256xf32> to vector<8x256xf32>
    %152 = arith.mulf %149, %151 : vector<8x256xf32>
    %153 = vector.extract_strided_slice %126 {offsets = [48, 0], sizes = [8, 256], strides = [1, 1]} : vector<72x256xf32> to vector<8x256xf32>
    %c241_i32 = arith.constant 241 : i32
    %154 = tpu.dynamic_rotate %153 by %c241_i32 dim 1 : vector<8x256xf32>, i32 -> vector<8x256xf32>
    %c6_61 = arith.constant 6 : index
    %c0_62 = arith.constant 0 : index
    %155 = vector.load %arg9[%c6_61, %c0_62] : memref<9x256xf32, #tpu.memory_space<vmem>>, vector<1x256xf32>
    %156 = vector.broadcast %155 : vector<1x256xf32> to vector<8x256xf32>
    %157 = arith.mulf %154, %156 : vector<8x256xf32>
    %158 = vector.extract_strided_slice %126 {offsets = [56, 0], sizes = [8, 256], strides = [1, 1]} : vector<72x256xf32> to vector<8x256xf32>
    %c240_i32 = arith.constant 240 : i32
    %159 = tpu.dynamic_rotate %158 by %c240_i32 dim 1 : vector<8x256xf32>, i32 -> vector<8x256xf32>
    %c7_63 = arith.constant 7 : index
    %c0_64 = arith.constant 0 : index
    %160 = vector.load %arg9[%c7_63, %c0_64] : memref<9x256xf32, #tpu.memory_space<vmem>>, vector<1x256xf32>
    %161 = vector.broadcast %160 : vector<1x256xf32> to vector<8x256xf32>
    %162 = arith.mulf %159, %161 : vector<8x256xf32>
    %163 = vector.extract_strided_slice %126 {offsets = [64, 0], sizes = [8, 256], strides = [1, 1]} : vector<72x256xf32> to vector<8x256xf32>
    %c239_i32 = arith.constant 239 : i32
    %164 = tpu.dynamic_rotate %163 by %c239_i32 dim 1 : vector<8x256xf32>, i32 -> vector<8x256xf32>
    %c8_65 = arith.constant 8 : index
    %c0_66 = arith.constant 0 : index
    %165 = vector.load %arg9[%c8_65, %c0_66] : memref<9x256xf32, #tpu.memory_space<vmem>>, vector<1x256xf32>
    %166 = vector.broadcast %165 : vector<1x256xf32> to vector<8x256xf32>
    %167 = arith.mulf %164, %166 : vector<8x256xf32>
    %168 = arith.addf %131, %136 : vector<8x256xf32>
    %169 = arith.addf %141, %146 : vector<8x256xf32>
    %170 = arith.addf %147, %152 : vector<8x256xf32>
    %171 = arith.addf %157, %162 : vector<8x256xf32>
    %172 = arith.addf %168, %169 : vector<8x256xf32>
    %173 = arith.addf %170, %171 : vector<8x256xf32>
    %174 = arith.addf %172, %173 : vector<8x256xf32>
    %175 = arith.addf %174, %167 : vector<8x256xf32>
    %c0_67 = arith.constant 0 : index
    %c0_68 = arith.constant 0 : index
    %176 = vector.load %arg11[%c0_67, %c0_68] : memref<8x1xf32, #tpu.memory_space<vmem>>, vector<8x1xf32>
    %177 = vector.broadcast %176 : vector<8x1xf32> to vector<8x256xf32>
    %178 = arith.addf %175, %177 : vector<8x256xf32>
    %cst_69 = arith.constant dense<0.000000e+00> : vector<8xf32>
    %179 = vector.multi_reduction <add>, %178, %cst_69 [1] : vector<8x256xf32> to vector<8xf32>
    %180 = vector.shape_cast %179 : vector<8xf32> to vector<8x1xf32>
    %cst_70 = arith.constant 3.906250e-03 : f32
    %181 = vector.broadcast %cst_70 : f32 to vector<8x1xf32>
    %182 = arith.mulf %180, %181 : vector<8x1xf32>
    %183 = vector.broadcast %182 : vector<8x1xf32> to vector<8x256xf32>
    %184 = arith.subf %178, %183 : vector<8x256xf32>
    %185 = arith.mulf %184, %184 : vector<8x256xf32>
    %cst_71 = arith.constant dense<0.000000e+00> : vector<8xf32>
    %186 = vector.multi_reduction <add>, %185, %cst_71 [1] : vector<8x256xf32> to vector<8xf32>
    %187 = vector.shape_cast %186 : vector<8xf32> to vector<8x1xf32>
    %cst_72 = arith.constant 3.906250e-03 : f32
    %188 = vector.broadcast %cst_72 : f32 to vector<8x1xf32>
    %189 = arith.mulf %187, %188 : vector<8x1xf32>
    %cst_73 = arith.constant 9.99999974E-6 : f32
    %190 = vector.broadcast %cst_73 : f32 to vector<8x1xf32>
    %191 = arith.addf %189, %190 : vector<8x1xf32>
    %192 = math.rsqrt %191 : vector<8x1xf32>
    %193 = vector.broadcast %192 : vector<8x1xf32> to vector<8x256xf32>
    %194 = arith.mulf %184, %193 : vector<8x256xf32>
    %c0_74 = arith.constant 0 : index
    %c0_75 = arith.constant 0 : index
    %195 = vector.load %arg12[%c0_74, %c0_75] : memref<8x1xf32, #tpu.memory_space<vmem>>, vector<8x1xf32>
    %196 = vector.broadcast %195 : vector<8x1xf32> to vector<8x256xf32>
    %197 = arith.mulf %194, %196 : vector<8x256xf32>
    %c0_76 = arith.constant 0 : index
    %c0_77 = arith.constant 0 : index
    %198 = vector.load %arg13[%c0_76, %c0_77] : memref<8x1xf32, #tpu.memory_space<vmem>>, vector<8x1xf32>
    %199 = vector.broadcast %198 : vector<8x1xf32> to vector<8x256xf32>
    %200 = arith.addf %197, %199 : vector<8x256xf32>
    %cst_78 = arith.constant 5.000000e-01 : f32
    %201 = vector.broadcast %cst_78 : f32 to vector<8x256xf32>
    %202 = arith.mulf %201, %200 : vector<8x256xf32>
    %cst_79 = arith.constant 1.41421354 : f32
    %203 = vector.broadcast %cst_79 : f32 to vector<8x256xf32>
    %204 = arith.divf %200, %203 : vector<8x256xf32>
    %cst_80 = arith.constant 0.000000e+00 : f32
    %205 = vector.broadcast %cst_80 : f32 to vector<8x256xf32>
    %206 = arith.cmpf oge, %204, %205 : vector<8x256xf32>
    %cst_81 = arith.constant 1.000000e+00 : f32
    %cst_82 = arith.constant -1.000000e+00 : f32
    %207 = vector.broadcast %cst_81 : f32 to vector<8x256xf32>
    %208 = vector.broadcast %cst_82 : f32 to vector<8x256xf32>
    %209 = arith.select %206, %207, %208 : vector<8x256xi1>, vector<8x256xf32>
    %210 = math.absf %204 : vector<8x256xf32>
    %cst_83 = arith.constant 0.327591091 : f32
    %211 = vector.broadcast %cst_83 : f32 to vector<8x256xf32>
    %212 = arith.mulf %211, %210 : vector<8x256xf32>
    %cst_84 = arith.constant 1.000000e+00 : f32
    %213 = vector.broadcast %cst_84 : f32 to vector<8x256xf32>
    %214 = arith.addf %213, %212 : vector<8x256xf32>
    %cst_85 = arith.constant 1.000000e+00 : f32
    %215 = vector.broadcast %cst_85 : f32 to vector<8x256xf32>
    %216 = arith.divf %215, %214 : vector<8x256xf32>
    %cst_86 = arith.constant 1.06140542 : f32
    %217 = vector.broadcast %cst_86 : f32 to vector<8x256xf32>
    %218 = arith.mulf %217, %216 : vector<8x256xf32>
    %cst_87 = arith.constant -1.45315206 : f32
    %219 = vector.broadcast %cst_87 : f32 to vector<8x256xf32>
    %220 = arith.addf %218, %219 : vector<8x256xf32>
    %221 = arith.mulf %220, %216 : vector<8x256xf32>
    %cst_88 = arith.constant 1.42141378 : f32
    %222 = vector.broadcast %cst_88 : f32 to vector<8x256xf32>
    %223 = arith.addf %221, %222 : vector<8x256xf32>
    %224 = arith.mulf %223, %216 : vector<8x256xf32>
    %cst_89 = arith.constant -0.284496725 : f32
    %225 = vector.broadcast %cst_89 : f32 to vector<8x256xf32>
    %226 = arith.addf %224, %225 : vector<8x256xf32>
    %227 = arith.mulf %226, %216 : vector<8x256xf32>
    %cst_90 = arith.constant 0.254829586 : f32
    %228 = vector.broadcast %cst_90 : f32 to vector<8x256xf32>
    %229 = arith.addf %227, %228 : vector<8x256xf32>
    %230 = arith.mulf %229, %216 : vector<8x256xf32>
    %cst_91 = arith.constant 0.000000e+00 : f32
    %231 = vector.broadcast %cst_91 : f32 to vector<8x256xf32>
    %232 = arith.subf %231, %210 : vector<8x256xf32>
    %233 = arith.mulf %232, %210 : vector<8x256xf32>
    %234 = math.exp %233 : vector<8x256xf32>
    %235 = arith.mulf %230, %234 : vector<8x256xf32>
    %cst_92 = arith.constant 1.000000e+00 : f32
    %236 = vector.broadcast %cst_92 : f32 to vector<8x256xf32>
    %237 = arith.subf %236, %235 : vector<8x256xf32>
    %238 = arith.mulf %209, %237 : vector<8x256xf32>
    %cst_93 = arith.constant 1.000000e+00 : f32
    %239 = vector.broadcast %cst_93 : f32 to vector<8x256xf32>
    %240 = arith.addf %239, %238 : vector<8x256xf32>
    %241 = arith.mulf %202, %240 : vector<8x256xf32>
    %c0_94 = arith.constant 0 : index
    %c0_95 = arith.constant 0 : index
    %242 = vector.load %arg15[%c0_94, %c0_95] : memref<1x8xf32, #tpu.memory_space<vmem>>, vector<1x8xf32>
    %cst_96 = arith.constant dense<0.000000e+00> : vector<1x256xf32>
    %243 = tpu.matmul %242, %241, %cst_96 {dimension_numbers = #tpu.dot_dimension_numbers<[1], [0], [0], [1], [0, 0, 1, 1], [], []>} : vector<1x8xf32>, vector<8x256xf32>, vector<1x256xf32> -> vector<1x256xf32>
    %c0_97 = arith.constant 0 : index
    %c0_98 = arith.constant 0 : index
    %244 = vector.load %arg14[%c0_97, %c0_98] : memref<256x576xbf16, #tpu.memory_space<vmem>>, vector<256x576xbf16>
    %245 = arith.extf %244 : vector<256x576xbf16> to vector<256x576xf32>
    %cst_99 = arith.constant dense<0.000000e+00> : vector<1x576xf32>
    %246 = tpu.matmul %243, %245, %cst_99 {dimension_numbers = #tpu.dot_dimension_numbers<[1], [0], [0], [1], [0, 0, 1, 1], [], []>} : vector<1x256xf32>, vector<256x576xf32>, vector<1x576xf32> -> vector<1x576xf32>
    %c0_100 = arith.constant 0 : index
    %c0_101 = arith.constant 0 : index
    %247 = vector.load %arg16[%c0_100, %c0_101] : memref<1x1xf32, #tpu.memory_space<vmem>>, vector<1x1xf32>
    %248 = vector.broadcast %247 : vector<1x1xf32> to vector<1x576xf32>
    %249 = arith.addf %246, %248 : vector<1x576xf32>
    %250 = arith.negf %249 : vector<1x576xf32>
    %251 = math.exp %250 : vector<1x576xf32>
    %cst_102 = arith.constant 1.000000e+00 : f32
    %252 = vector.broadcast %cst_102 : f32 to vector<1x576xf32>
    %253 = arith.addf %252, %251 : vector<1x576xf32>
    %254 = arith.divf %252, %253 : vector<1x576xf32>
    %c0_103 = arith.constant 0 : index
    %c0_104 = arith.constant 0 : index
    %c0_105 = arith.constant 0 : index
    %255 = vector.load %arg17[%c0_103, %c0_104, %c0_105] : memref<1x1x576xf32, #tpu.memory_space<vmem>>, vector<1x1x576xf32>
    %256 = vector.shape_cast %255 : vector<1x1x576xf32> to vector<1x576xf32>
    %257 = vector.shape_cast %254 : vector<1x576xf32> to vector<1x1x576xf32>
    tpu.vector_store %arg17[%c0_103, %c0_104, %c0_105], %257 {strides = array<i32>} : memref<1x1x576xf32, #tpu.memory_space<vmem>>, vector<1x1x576xf32>,
    return
  }
  func.func @transform_0(%arg0: i32) -> (i32, i32, i32) {
    %c0_i32 = arith.constant 0 : i32
    %c0_i32_0 = arith.constant 0 : i32
    %c0_i32_1 = arith.constant 0 : i32
    return %arg0, %c0_i32, %c0_i32_0 : i32, i32, i32
  }
  func.func @transform_1(%arg0: i32) -> (i32, i32) {
    %c0_i32 = arith.constant 0 : i32
    %c0_i32_0 = arith.constant 0 : i32
    %c0_i32_1 = arith.constant 0 : i32
    return %c0_i32, %c0_i32_0 : i32, i32
  }
  func.func @transform_2(%arg0: i32) -> (i32, i32) {
    %c0_i32 = arith.constant 0 : i32
    %c0_i32_0 = arith.constant 0 : i32
    %c0_i32_1 = arith.constant 0 : i32
    return %c0_i32, %c0_i32_0 : i32, i32
  }
  func.func @transform_3(%arg0: i32) -> (i32, i32) {
    %c0_i32 = arith.constant 0 : i32
    %c0_i32_0 = arith.constant 0 : i32
    %c0_i32_1 = arith.constant 0 : i32
    return %c0_i32, %c0_i32_0 : i32, i32
  }
  func.func @transform_4(%arg0: i32) -> (i32, i32) {
    %c0_i32 = arith.constant 0 : i32
    %c0_i32_0 = arith.constant 0 : i32
    %c0_i32_1 = arith.constant 0 : i32
    return %c0_i32, %c0_i32_0 : i32, i32
  }
  func.func @transform_5(%arg0: i32) -> (i32, i32) {
    %c0_i32 = arith.constant 0 : i32
    %c0_i32_0 = arith.constant 0 : i32
    %c0_i32_1 = arith.constant 0 : i32
    return %c0_i32, %c0_i32_0 : i32, i32
  }
  func.func @transform_6(%arg0: i32) -> (i32, i32) {
    %c0_i32 = arith.constant 0 : i32
    %c0_i32_0 = arith.constant 0 : i32
    %c0_i32_1 = arith.constant 0 : i32
    return %c0_i32, %c0_i32_0 : i32, i32
  }
  func.func @transform_7(%arg0: i32) -> (i32, i32) {
    %c0_i32 = arith.constant 0 : i32
    %c0_i32_0 = arith.constant 0 : i32
    %c0_i32_1 = arith.constant 0 : i32
    return %c0_i32, %c0_i32_0 : i32, i32
  }
  func.func @transform_8(%arg0: i32) -> (i32, i32) {
    %c0_i32 = arith.constant 0 : i32
    %c0_i32_0 = arith.constant 0 : i32
    %c0_i32_1 = arith.constant 0 : i32
    return %c0_i32, %c0_i32_0 : i32, i32
  }
  func.func @transform_9(%arg0: i32) -> (i32, i32) {
    %c0_i32 = arith.constant 0 : i32
    %c0_i32_0 = arith.constant 0 : i32
    %c0_i32_1 = arith.constant 0 : i32
    return %c0_i32, %c0_i32_0 : i32, i32
  }
  func.func @transform_10(%arg0: i32) -> (i32, i32) {
    %c0_i32 = arith.constant 0 : i32
    %c0_i32_0 = arith.constant 0 : i32
    %c0_i32_1 = arith.constant 0 : i32
    return %c0_i32, %c0_i32_0 : i32, i32
  }
  func.func @transform_11(%arg0: i32) -> (i32, i32) {
    %c0_i32 = arith.constant 0 : i32
    %c0_i32_0 = arith.constant 0 : i32
    %c0_i32_1 = arith.constant 0 : i32
    return %c0_i32, %c0_i32_0 : i32, i32
  }
  func.func @transform_12(%arg0: i32) -> (i32, i32) {
    %c0_i32 = arith.constant 0 : i32
    %c0_i32_0 = arith.constant 0 : i32
    %c0_i32_1 = arith.constant 0 : i32
    return %c0_i32, %c0_i32_0 : i32, i32
  }
  func.func @transform_13(%arg0: i32) -> (i32, i32) {
    %c0_i32 = arith.constant 0 : i32
    %c0_i32_0 = arith.constant 0 : i32
    %c0_i32_1 = arith.constant 0 : i32
    return %c0_i32, %c0_i32_0 : i32, i32
  }
  func.func @transform_14(%arg0: i32) -> (i32, i32) {
    %c0_i32 = arith.constant 0 : i32
    %c0_i32_0 = arith.constant 0 : i32
    %c0_i32_1 = arith.constant 0 : i32
    return %c0_i32, %c0_i32_0 : i32, i32
  }
  func.func @transform_15(%arg0: i32) -> (i32, i32) {
    %c0_i32 = arith.constant 0 : i32
    %c0_i32_0 = arith.constant 0 : i32
    %c0_i32_1 = arith.constant 0 : i32
    return %c0_i32, %c0_i32_0 : i32, i32
  }
  func.func @transform_16(%arg0: i32) -> (i32, i32, i32) {
    %c0_i32 = arith.constant 0 : i32
    %c0_i32_0 = arith.constant 0 : i32
    %c0_i32_1 = arith.constant 0 : i32
    return %arg0, %c0_i32, %c0_i32_0 : i32, i32, i32
  }
}

</mosaic_0001>

<bundles_post_ra>
// kernel: density_decoder_forward.1
= control target key start
LH: loop header
LB: loop body
LE: loop exit
PB: predicated region body
PF: predicated region fallthrough
CT: control target
= control target key end

     0   :  { %s3684_s0 = inlined_call_operand.vmem [shape: f32[2,32,64], index: 0, kind: input, shape index: {}]   ;;  %s3685_s1 = inlined_call_operand.vmem [shape: f32[9,64], index: 1, kind: input, shape index: {}]   ;;  %s3686_s2 = inlined_call_operand.vmem [shape: f32[144,32], index: 2, kind: input, shape index: {}]   ;;  %s3687_s3 = inlined_call_operand.vmem [shape: f32[16,1], index: 3, kind: input, shape index: {}]   ;;  %s3688_s4 = inlined_call_operand.vmem [shape: f32[16,1], index: 4, kind: input, shape index: {}]   ;;  %s3689_s5 = inlined_call_operand.vmem [shape: f32[16,1], index: 5, kind: input, shape index: {}]   ;;  %s3690_s6 = inlined_call_operand.vmem [shape: f32[16,16], index: 6, kind: input, shape index: {}]   ;;  %s3691_s7 = inlined_call_operand.hbm [shape: bf16[64,256], index: 7, kind: input, shape index: {}]   ;;  %s3692_s8 = inlined_call_operand.hbm [shape: f32[9,256], index: 8, kind: input, shape index: {}]   ;;  %s3693_s9 = inlined_call_operand.vmem [shape: f32[72,16], index: 9, kind: input, shape index: {}]   ;;  %s3694_s10 = inlined_call_operand.vmem [shape: f32[8,1], index: 10, kind: input, shape index: {}]   ;;  %s3695_s11 = inlined_call_operand.vmem [shape: f32[8,1], index: 11, kind: input, shape index: {}]   ;;  %s3696_s12 = inlined_call_operand.vmem [shape: f32[8,1], index: 12, kind: input, shape index: {}]   ;;  %s3697_s13 = inlined_call_operand.hbm [shape: bf16[256,576], index: 13, kind: input, shape index: {}]   ;;  %s3698_s14 = inlined_call_operand.vmem [shape: f32[1,8], index: 14, kind: input, shape index: {}]   ;;  %s3699_s15 = inlined_call_operand.<no memory space> [shape: f32[1,1], index: 15, kind: input, shape index: {}]   ;;  %s3700_s16 = inlined_call_operand.vmem [shape: f32[2,1,576], index: 16, kind: output, shape index: {}]  }
   0x1   :  { %3702 = sst [smem:[#allocation11_spill]] %s3684_s0  ;;  %v21_v0 = vstv %s3699_s15 }
   0x2   :  { %3703 = sst [smem:[#allocation12_spill]] %s3691_s7  ;;  %22 = vst [vmem:[#allocation2] sm:$0x1] %v21_v0 }
   0x3   :  { %3704 = sst [smem:[#allocation13_spill]] %s3692_s8 }
   0x4   :  { %3705 = sst [smem:[#allocation14_spill]] %s3700_s16 }
   0x5   :  { %23 = vsyncpa [#allocation4], 0 }
   0x6   :  { %24 = vsyncpa [#allocation6], 0  ;;  %s2823_s23 = smov 0  }
   0x7 LB: > { %3706 = sst [smem:[#allocation10_spill]] %s2700_s23  ;;  %s2832_s27 = sadd.s32 4294967295, %s2700_s23   ;;  %s2700_s23 = sphi %s2823_s23, %s30_s23  }
   0x8   : > { %s3707_s8 = sld [smem:[#allocation13_spill]]  ;;  %p2396_p0 = scmp.ge.s32.totalorder %s2700_s23, 1 }
   0x9   : > { %p402_p1 = scmp.lt.s32.totalorder %s2700_s23, 3  ;;  %p2484_p2 = scmp.eq.s32.totalorder %s2832_s27, 0 }
   0xa   : > { %s2702_s28 = smov [#allocation5]   ;;  %s3709_s7 = sld [smem:[#allocation12_spill]] }
   0xb   : > { %p2837_p3 = pnand %p2396_p0, %p402_p1  ;;  %s447_s29 = sshll.u32 %s2702_s28, 4  ;;  %s448_s29 = int_to_ptr.vmem [resolvable:$true] %s447_s29 }
   0xc   : > { %s2703_s19 = smov [#allocation3]   ;;  %s2704_s21 = smov 256  }
   0xd   : > { %p2474_p4 = pneg %p2837_p3  ;;  %s433_s20 = sshll.u32 %s2703_s19, 4  ;;  %s434_s20 = int_to_ptr.vmem [resolvable:$true] %s433_s20 }
   0xe   : > { %s445_s26 = sshll.u32 %s3707_s8, 4  ;;  %s2705_s22 = smov 16   ;;  %s446_s26 = int_to_ptr.hbm [resolvable:$true] %s445_s26 }
   0xf   : > { %p2848_p5 = pnand %p2484_p2, %p2474_p4  ;;  %s471_s28 = sshll.u32 %s3697_s13, 4  ;;  %s472_s28 = int_to_ptr.hbm [resolvable:$true] %s471_s28 }
  0x10   : > { %s431_s17 = sshll.u32 %s3709_s7, 4  ;;  %s2706_s30 = smov 128   ;;  %s432_s17 = int_to_ptr.hbm [resolvable:$true] %s431_s17 }
  0x11   : > { %2480 = dma.hbm_to_vmem [thread:$0]  (!%p2848_p5), %s446_s26, 512, %s448_s29, [#allocation6], %s2704_s21, %s2704_s21, %s2705_s22  }
  0x12   : > { %s2707_s0 = smov 8   ;;  %s2708_s7 = smov [#allocation7]  }
  0x13   : > { %2477 = dma.hbm_to_vmem [thread:$0]  (!%p2848_p5), %s432_s17, 1024, %s434_s20, [#allocation4], %s2706_s30, %s2706_s30, %s2707_s0  }
  0x14   : > { %s473_s8 = sshll.u32 %s2708_s7, 4  ;;  %s2709_s23 = smov 320   ;;  %s474_s8 = int_to_ptr.vmem [resolvable:$true] %s473_s8 }
  0x15   : > { %s2710_s16 = smov 20   ;;  %503 = sbr.rel (%p2837_p3) target bundleno = 2938 (0xb7a), region = 84 }
  0x16   : > { %2483 = dma.hbm_to_vmem [thread:$0]  (!%p2848_p5), %s472_s28, 10240, %s474_s8, [#allocation6], %s2709_s23, %s2709_s23, %s2710_s16  }
  0x1a   : > { %2691 = dma.done.wait (%p2484_p2), [#allocation4], 1024  }
  0x1b   : > { %2693 = vsyncadd (%p2484_p2), [#allocation4], 4294966272 }
  0x1c   : > { %2695 = dma.done.wait (%p2484_p2), [#allocation6], 10752  }
  0x1d   : > { %2697 = vsyncadd (%p2484_p2), [#allocation6], 4294956544  ;;  %p563_p6 = scmp.lt.s32.totalorder %s2832_s27, 1  ;;  %s3711_s23 = sld [smem:[#allocation11_spill]]  ;;  %v576_v5 = vld [vmem:[%s3686_s2] sm:$0xff]  ;;  %vm594_vm0 = vcmask 261120  }
  0x1e   : > { %v577_v6 = vld [vmem:[%s3686_s2 + $0x8] sm:$0xff]  ;;  %v578_v7 = vld [vmem:[%s3686_s2 + $0x10] sm:$0xff]  ;;  %v579_v8 = vld [vmem:[%s3686_s2 + $0x18] sm:$0xff]  ;;  %s2711_s8 = smov 64   ;;  %s2712_s18 = smov 8   ;;  %vm720_vm1 = vcmask 1048064  }
  0x1f   : > { %s3725_s27 = smov (!%p563_p6, %s2832_s27), 1  ;;  %v580_v9 = vld [vmem:[%s3686_s2 + $0x20] sm:$0xff]  ;;  %v581_v10 = vld [vmem:[%s3686_s2 + $0x28] sm:$0xff]  ;;  %v582_v11 = vld [vmem:[%s3686_s2 + $0x30] sm:$0xff]  ;;  %s2713_s21 = smov 63   ;;  %vm985_vm2 = vcmask 130048  }
  0x20   : > { %s2460_s7 = sshll.u32 %s3725_s27, 5  ;;  %v583_v12 = vld [vmem:[%s3686_s2 + $0x38] sm:$0xff]  ;;  %v584_v13 = vld [vmem:[%s3686_s2 + $0x40] sm:$0xff]  ;;  %v585_v14 = vld [vmem:[%s3686_s2 + $0x48] sm:$0xff]  ;;  %s2714_s25 = smov 7   ;;  %vm1015_vm3 = vcmask 523264  }
  0x21   : > { %v586_v15 = vld [vmem:[%s3686_s2 + $0x50] sm:$0xff]  ;;  %v587_v16 = vld [vmem:[%s3686_s2 + $0x58] sm:$0xff]  ;;  %v588_v17 = vld [vmem:[%s3686_s2 + $0x60] sm:$0xff]  ;;  %s2715_s0 = smov 1   ;;  %s2718_s15 = smov 122  }
  0x22   : > { %v589_v18 = vld [vmem:[%s3686_s2 + $0x68] sm:$0xff]  ;;  %v590_v19 = vld [vmem:[%s3686_s2 + $0x70] sm:$0xff]  ;;  %v591_v20 = vld [vmem:[%s3686_s2 + $0x78] sm:$0xff]  ;;  %s2721_s22 = smov 121   ;;  %s2722_s28 = smov 55  }
  0x23   : > { %s567_s26 = scalar_lea.vmem %s3711_s23, %s2460_s7  ;;  %v592_v36 = vld [vmem:[%s3686_s2 + $0x80] sm:$0xff]  ;;  %v593_v38 = vld [vmem:[%s3686_s2 + $0x88] sm:$0xff]  ;;  %s2716_s7 = smov 127  }
  0x24   : > { %v575_v1 = vld [vmem:[%s567_s26 + $0x18] sm:$0xff]  ;;  %v574_v2 = vld [vmem:[%s567_s26 + $0x10] sm:$0xff]  ;;  %v573_v3 = vld [vmem:[%s567_s26 + $0x8] sm:$0xff]  ;;  %s2724_s30 = smov 46   ;;  %s2726_s29 = smov 73  }
  0x25   : > { %661 = vmatpush.msra.mxu0 %v575_v1  ;;  %v572_v4 = vld [vmem:[%s567_s26] sm:$0xff]  ;;  %s2717_s26 = smov 57   ;;  %s2731_s17 = smov 15  }
  0x26   : > { %v2544_v39 = vld [vmem:[%s3685_s1 + $0x7] ss:$0 sm:$0xff]  ;;  %v2545_v42 = vld [vmem:[%s3685_s1 + $0x3] ss:$0 sm:$0xff]  ;;  %v2546_v53 = vld [vmem:[%s3685_s1 + $0x6] ss:$0 sm:$0xff] }
  0x27   : > { %662 = vmatpush.msra.mxu0 %v574_v2  ;;  %v2547_v55 = vld [vmem:[%s3685_s1 + $0x5] ss:$0 sm:$0xff]  ;;  %s2733_s19 = smov 112   ;;  %s2734_s20 = smov 111  }
  0x29   : > { %663 = vmatpush.msra.mxu0 %v573_v3 }
  0x2b   : > { %664 = vmatpush.msra.mxu0 %v572_v4  ;;  %v2548_v4 = vld [vmem:[%s3685_s1 + $0x2] ss:$0 sm:$0xff] }
  0x2c   : > { %2407 = vmatmul.msk.f32.vlgmr.msra.gmra.mxu0 %vm594_vm0, %v576_v5 }
  0x34   : > { %2408 = vmatmul.msk.f32.gmra.mxu0 %vm594_vm0, %v577_v6 }
  0x3c   : > { %2409 = vmatmul.msk.f32.gmra.mxu0 %vm594_vm0, %v578_v7 }
  0x44   : > { %2410 = vmatmul.msk.f32.gmra.mxu0 %vm594_vm0, %v579_v8 }
  0x4c   : > { %2411 = vmatmul.msk.f32.gmra.mxu0 %vm594_vm0, %v580_v9 }
  0x54   : > { %2412 = vmatmul.msk.f32.gmra.mxu0 %vm594_vm0, %v581_v10 }
  0x5c   : > { %2413 = vmatmul.msk.f32.gmra.mxu0 %vm594_vm0, %v582_v11 }
  0x64   : > { %2414 = vmatmul.msk.f32.gmra.mxu0 %vm594_vm0, %v583_v12 }
  0x6c   : > { %2415 = vmatmul.msk.f32.gmra.mxu0 %vm594_vm0, %v584_v13 }
  0x74   : > { %2416 = vmatmul.msk.f32.gmra.mxu0 %vm594_vm0, %v585_v14 }
  0x7c   : > { %2417 = vmatmul.msk.f32.gmra.mxu0 %vm594_vm0, %v586_v15 }
  0x84   : > { %2418 = vmatmul.msk.f32.gmra.mxu0 %vm594_vm0, %v587_v16  ;;  %v2549_v16 = vld [vmem:[%s3685_s1 + $0x1] ss:$0 sm:$0xff] }
  0x8c   : > { %2419 = vmatmul.msk.f32.gmra.mxu0 %vm594_vm0, %v588_v17 }
  0x94   : > { %2420 = vmatmul.msk.f32.gmra.mxu0 %vm594_vm0, %v589_v18 }
  0x9c   : > { %2421 = vmatmul.msk.f32.gmra.mxu0 %vm594_vm0, %v590_v19 }
  0xa4   : > { %2422 = vmatmul.msk.f32.gmra.mxu0 %vm594_vm0, %v591_v20 }
  0xa9   : > { %v2943_v21 = vpop.f32.mrf.mxu0 }
  0xac   : > { %2423 = vmatmul.msk.f32.gmra.mxu0 %vm594_vm0, %v592_v36 }
  0xb1   : > { %v2945_v22 = vpop.f32.mrf.mxu0 }
  0xb4   : > { %2424 = vmatmul.msk.f32.gmra.mxu0 %vm594_vm0, %v593_v38 }
  0xb9   : > { %v2947_v23 = vpop.f32.mrf.mxu0 }
  0xc1   : > { %v2949_v24 = vpop.f32.mrf.mxu0 }
  0xc9   : > { %v2951_v25 = vpop.f32.mrf.mxu0 }
  0xd1   : > { %v2953_v26 = vpop.f32.mrf.mxu0 }
  0xd9   : > { %v2955_v27 = vpop.f32.mrf.mxu0 }
  0xe1   : > { %v2957_v28 = vpop.f32.mrf.mxu0 }
  0xe2   : > { %784 = vrot.lane.b32.xlu1 %v2957_v28, %s2711_s8 }
  0xe9   : > { %v2961_v29 = vpop.f32.mrf.mxu0 }
  0xf1   : > { %v2963_v30 = vpop.f32.mrf.mxu0 }
  0xf9   : > { %v2965_v31 = vpop.f32.mrf.mxu0 }
 0x101   : > { %v2967_v32 = vpop.f32.mrf.mxu0 }
 0x102   : > { %804 = vrot.lane.b32.xlu1 %v2967_v32, %s2711_s8 }
 0x109   : > { %v2971_v33 = vpop.f32.mrf.mxu0 }
 0x10a   : > { %801 = vrot.lane.b32.xlu1 %v2965_v31, %s2711_s8 }
 0x111   : > { %v2975_v34 = vpop.f32.mrf.mxu0 }
 0x112   : > { %824 = vrot.lane.b32.xlu2 %v2975_v34, %s2711_s8 }
 0x119   : > { %v2979_v35 = vpop.f32.mrf.mxu0 }
 0x11a   : > { %821 = vrot.lane.b32.xlu2 %v2971_v33, %s2711_s8 }
 0x121   : > { %v711_v37 = vpop.f32.mrf.mxu0 }
 0x122   : > { %744 = vrot.lane.b32.xlu2 %v2949_v24, %s2711_s8  ;;  %844 = vrot.lane.b32.xlu0 %v711_v37, %s2711_s8 }
 0x129   : > { %v3037_v57 = vpop.f32.mrf.mxu0 }
 0x12a   : > { %841 = vrot.lane.b32.xlu0 %v2979_v35, %s2711_s8 }
 0x131   : > { %v3042_v60 = vpop.f32.mrf.mxu0 }
 0x132   : > { %781 = vrot.lane.b32.xlu0 %v2955_v27, %s2711_s8 }
 0x13a   : > { %856 = vrot.lane.b32.xlu0 %v2544_v39, %s2712_s18  ;;  %s2719_s18 = smov 56  }
 0x142   : > { %764 = vrot.lane.b32.xlu0 %v2953_v26, %s2711_s8 }
 0x154   : > { %v785_v43 = vpop.permute.xlu1 %784 }
 0x155   : > { %v786_v51 = vsel %vm720_vm1, %v785_v43, %v2957_v28 }
 0x16c   : > { %v825_v40 = vpop.permute.xlu2 %824 }
 0x16d   : > { %v826_v41 = vsel %vm720_vm1, %v825_v40, %v2975_v34 }
 0x16e   : > { %829 = vrot.lane.b32.xlu0 %v826_v41, %s2711_s8 }
 0x174   : > { %v805_v46 = vpop.permute.xlu1 %804  ;;  %v822_v54 = vpop.permute.xlu2 %821 }
 0x175   : > { %v806_v48 = vsel %vm720_vm1, %v805_v46, %v2967_v32  ;;  %v823_v56 = vsel %vm720_vm1, %v822_v54, %v2971_v33 }
 0x176   : > { %796 = vrot.lane.b32.xlu0 %v2545_v42, %s2713_s21  ;;  %v2550_v42 = vld [vmem:[%s3685_s1 + $0x8] ss:$0 sm:$0xff]  ;;  %s2720_s21 = smov 9  }
 0x17c   : > { %v802_v58 = vpop.permute.xlu1 %801  ;;  %v745_v61 = vpop.permute.xlu2 %744 }
 0x17d   : > { %v803_v59 = vsel %vm720_vm1, %v802_v58, %v2965_v31  ;;  %v746_v13 = vsel %vm720_vm1, %v745_v61, %v2949_v24 }
 0x194   : > { %v845_v44 = vpop.permute.xlu0 %844 }
 0x195   : > { %v846_v45 = vsel %vm720_vm1, %v845_v44, %v711_v37 }
 0x196   : > { %849 = vrot.lane.b32.xlu2 %v846_v45, %s2711_s8 }
 0x19c   : > { %v842_v47 = vpop.permute.xlu0 %841 }
 0x19d   : > { %v843_v49 = vsel %vm720_vm1, %v842_v47, %v2979_v35 }
 0x19e   : > { %809 = vrot.lane.b32.xlu2 %v806_v48, %s2711_s8  ;;  %847 = vrot.lane.b32.xlu1 %v843_v49, %s2711_s8 }
 0x1a4   : > { %v782_v50 = vpop.permute.xlu0 %781 }
 0x1a5   : > { %v783_v52 = vsel %vm720_vm1, %v782_v50, %v2955_v27 }
 0x1a6   : > { %761 = vrot.lane.b32.xlu2 %v2951_v25, %s2711_s8  ;;  %789 = vrot.lane.b32.xlu1 %v786_v51, %s2711_s8 }
 0x1a7   : > { %787 = vrot.lane.b32.xlu0 %v783_v52, %s2711_s8 }
 0x1ac   : > { %v857_v63 = vpop.permute.xlu0 %856 }
 0x1ae   : > { %836 = vrot.lane.b32.xlu2 %v2546_v53, %s2714_s25  ;;  %741 = vrot.lane.b32.xlu1 %v2947_v23, %s2711_s8 }
 0x1b4   : > { %v765_v2 = vpop.permute.xlu0 %764 }
 0x1b5   : > { %v766_v3 = vsel %vm720_vm1, %v765_v2, %v2953_v26 }
 0x1b6   : > { %827 = vrot.lane.b32.xlu2 %v823_v56, %s2711_s8  ;;  %816 = vrot.lane.b32.xlu1 %v2547_v55, %s2715_s0  ;;  %v2551_v56 = vld [vmem:[%s3685_s1] ss:$0 sm:$0xff] }
 0x1be   : > { %807 = vrot.lane.b32.xlu1 %v803_v59, %s2711_s8 }
 0x1c6   : > { %864 = vrot.lane.b32.xlu1 %v3042_v60, %s2711_s8 }
 0x1ce   : > { %724 = vrot.lane.b32.xlu1 %v2945_v22, %s2711_s8 }
 0x1d6   : > { %721 = vrot.lane.b32.xlu1 %v2943_v21, %s2711_s8 }
 0x1e0   : > { %v830_v6 = vpop.permute.xlu0 %829 }
 0x1e1   : > { %v832_v45 = vsel %vm720_vm1, %v830_v6, %v2975_v34 }
 0x1e8   : > { %v797_v10 = vpop.permute.xlu0 %796 }
 0x1f0   : > { %v850_v62 = vpop.permute.xlu2 %849 }
 0x1f1   : > { %v852_v0 = vsel %vm720_vm1, %v850_v62, %v711_v37 }
 0x1f2   : > { %v860_v1 = vmul.f32 %v857_v63, %v852_v0 }
 0x1f4   : > { %915 = vrot.lane.b32.xlu0 %v860_v1, %s2716_s7 }
 0x1f8   : > { %v810_v14 = vpop.permute.xlu2 %809 }
 0x1f9   : > { %v812_v18 = vsel %vm720_vm1, %v810_v14, %v2967_v32 }
 0x1fc   : > { %861 = vrot.lane.b32.xlu0 %v3037_v57, %s2711_s8 }
 0x200   : > { %v762_v19 = vpop.permute.xlu2 %761 }
 0x204   : > { %769 = vrot.lane.b32.xlu0 %v766_v3, %s2711_s8 }
 0x208   : > { %v837_v44 = vpop.permute.xlu2 %836 }
 0x209   : > { %v840_v46 = vmul.f32 %v837_v44, %v832_v45 }
 0x20c   : > { %776 = vrot.lane.b32.xlu0 %v2548_v4, %s2717_s26  ;;  %s3722_s26 = sld [smem:[#allocation14_spill]] }
 0x210   : > { %v848_v5 = vpop.permute.xlu1 %847  ;;  %v828_v47 = vpop.permute.xlu2 %827 }
 0x211   : > { %v851_v7 = vsel %vm720_vm1, %v848_v5, %v2979_v35  ;;  %v763_v35 = vsel %vm720_vm1, %v762_v19, %v2951_v25  ;;  %v831_v50 = vsel %vm720_vm1, %v828_v47, %v2971_v33 }
 0x212   : > { %v859_v8 = vmul.f32 %v857_v63, %v851_v7  ;;  %v839_v51 = vmul.f32 %v837_v44, %v831_v50 }
 0x214   : > { %913 = vrot.lane.b32.xlu2 %v859_v8, %s2716_s7 }
 0x218   : > { %v790_v9 = vpop.permute.xlu1 %789 }
 0x219   : > { %v792_v11 = vsel %vm720_vm1, %v790_v9, %v2957_v28  ;;  %v788_v36 = vpop.permute.xlu0 %787 }
 0x21a   : > { %v800_v12 = vmul.f32 %v797_v10, %v792_v11  ;;  %v791_v37 = vsel %vm720_vm1, %v788_v36, %v2955_v27 }
 0x21b   : > { %v799_v40 = vmul.f32 %v797_v10, %v791_v37 }
 0x21c   : > { %749 = vrot.lane.b32.xlu2 %v746_v13, %s2711_s8  ;;  %895 = vrot.lane.b32.xlu0 %v800_v12, %s2718_s15 }
 0x220   : > { %v742_v15 = vpop.permute.xlu1 %741 }
 0x221   : > { %v743_v17 = vsel %vm720_vm1, %v742_v15, %v2947_v23  ;;  %v961_v15 = vld [vmem:[%s3687_s3] sm:$0xff] }
 0x222   : > { %747 = vrot.lane.b32.xlu1 %v743_v17, %s2711_s8 }
 0x224   : > { %756 = vrot.lane.b32.xlu2 %v2549_v16, %s2719_s18  ;;  %v2725_v16 = vmov 0   ;;  %s2732_s18 = smov 113  }
 0x225   : > { %2532 = vset.pattern.permute.xlu0 %v2725_v16  ;;  %2531 = vset.pattern.permute.xlu2 %v2725_v16 }
 0x226   : > { %2543 = vset.pattern.permute.xlu1 %v2725_v16 }
 0x228   : > { %v817_v20 = vpop.permute.xlu1 %816 }
 0x229   : > { %v820_v28 = vmul.f32 %v817_v20, %v812_v18 }
 0x22b   : > { %905 = vrot.lane.b32.xlu1 %v820_v28, %s2716_s7 }
 0x22c   : > { %767 = vrot.lane.b32.xlu2 %v763_v35, %s2711_s8 }
 0x230   : > { %v808_v38 = vpop.permute.xlu1 %807 }
 0x231   : > { %v811_v39 = vsel %vm720_vm1, %v808_v38, %v2965_v31 }
 0x232   : > { %v819_v32 = vmul.f32 %v817_v20, %v811_v39 }
 0x234   : > { %893 = vrot.lane.b32.xlu2 %v799_v40, %s2718_s15  ;;  %903 = vrot.lane.b32.xlu0 %v819_v32, %s2716_s7  ;;  %s2729_s15 = smov 17  }
 0x238   : > { %v865_v41 = vpop.permute.xlu1 %864 }
 0x239   : > { %v866_v43 = vsel %vm720_vm1, %v865_v41, %v3042_v60 }
 0x23c   : > { %876 = vrot.lane.b32.xlu0 %v2550_v42, %s2720_s21  ;;  %869 = vrot.lane.b32.xlu2 %v866_v43, %s2711_s8 }
 0x240   : > { %v725_v27 = vpop.permute.xlu1 %724 }
 0x241   : > { %v726_v31 = vsel %vm720_vm1, %v725_v27, %v2945_v22 }
 0x244   : > { %729 = vrot.lane.b32.xlu0 %v726_v31, %s2711_s8 }
 0x248   : > { %v722_v34 = vpop.permute.xlu1 %721 }
 0x249   : > { %v723_v59 = vsel %vm720_vm1, %v722_v34, %v2943_v21 }
 0x266   : > { %v916_v48 = vpop.permute.xlu0 %915 }
 0x267   : > { %v920_v49 = vadd.f32 %v916_v48, %v840_v46 }
 0x269   : > { %935 = vrot.lane.b32.xlu1 %v920_v49, %s2721_s22 }
 0x26e   : > { %v914_v52 = vpop.permute.xlu2 %913  ;;  %v862_v53 = vpop.permute.xlu0 %861 }
 0x26f   : > { %v919_v54 = vadd.f32 %v914_v52, %v839_v51  ;;  %v863_v55 = vsel %vm720_vm1, %v862_v53, %v3037_v57 }
 0x270   : > { %867 = vrot.lane.b32.xlu2 %v863_v55, %s2711_s8 }
 0x271   : > { %933 = vrot.lane.b32.xlu1 %v919_v54, %s2721_s22 }
 0x276   : > { %v750_v58 = vpop.permute.xlu2 %749  ;;  %v770_v33 = vpop.permute.xlu0 %769 }
 0x277   : > { %v752_v61 = vsel %vm720_vm1, %v750_v58, %v2949_v24  ;;  %v772_v3 = vsel %vm720_vm1, %v770_v33, %v2953_v26 }
 0x278   : > { %727 = vrot.lane.b32.xlu2 %v723_v59, %s2711_s8  ;;  %s2723_s8 = smov 126  }
 0x279   : > { %736 = vrot.lane.b32.xlu1 %v2551_v56, %s2722_s28 }
 0x27e   : > { %v757_v62 = vpop.permute.xlu2 %756  ;;  %v777_v0 = vpop.permute.xlu0 %776 }
 0x27f   : > { %v760_v63 = vmul.f32 %v757_v62, %v752_v61  ;;  %v780_v4 = vmul.f32 %v777_v0, %v772_v3 }
 0x281   : > { %885 = vrot.lane.b32.xlu0 %v760_v63, %s2716_s7  ;;  %v976_v63 = vld [vmem:[%s3690_s6 + $0x8] sm:$0xff] }
 0x286   : > { %v768_v1 = vpop.permute.xlu2 %767 }
 0x287   : > { %v771_v2 = vsel %vm720_vm1, %v768_v1, %v2951_v25 }
 0x288   : > { %v779_v5 = vmul.f32 %v777_v0, %v771_v2 }
 0x28e   : > { %v894_v6 = vpop.permute.xlu2 %893  ;;  %v896_v7 = vpop.permute.xlu0 %895 }
 0x28f   : > { %v899_v8 = vadd.f32 %v894_v6, %v779_v5  ;;  %v900_v9 = vadd.f32 %v896_v7, %v780_v4  ;;  %v1091_v4 = vld [vmem:[%s3688_s4] sm:$0xff] }
 0x291   : > { %923 = vrot.lane.b32.xlu0 %v899_v8, %s2723_s8  ;;  %925 = vrot.lane.b32.xlu2 %v900_v9, %s2723_s8 }
 0x294   : > { %v748_v24 = vpop.permute.xlu1 %747 }
 0x295   : > { %v751_v10 = vsel %vm720_vm1, %v748_v24, %v2947_v23 }
 0x296   : > { %v759_v11 = vmul.f32 %v757_v62, %v751_v10  ;;  %v870_v12 = vpop.permute.xlu2 %869  ;;  %v975_v62 = vld [vmem:[%s3690_s6] sm:$0xff] }
 0x297   : > { %v872_v26 = vsel %vm720_vm1, %v870_v12, %v3042_v60 }
 0x298   : > { %883 = vrot.lane.b32.xlu1 %v759_v11, %s2716_s7 }
 0x29d   : > { %v906_v23 = vpop.permute.xlu1 %905 }
 0x29e   : > { %v910_v17 = vadd.f32 %v906_v23, %v2963_v30  ;;  %v962_v30 = vld [vmem:[%s3687_s3 + $0x8] sm:$0xff] }
 0x2a6   : > { %v904_v25 = vpop.permute.xlu0 %903 }
 0x2a7   : > { %v909_v28 = vadd.f32 %v904_v25, %v2961_v29 }
 0x2ae   : > { %v877_v13 = vpop.permute.xlu0 %876 }
 0x2af   : > { %v880_v14 = vmul.f32 %v877_v13, %v872_v26 }
 0x2b1   : > { %955 = vrot.lane.b32.xlu0 %v880_v14, %s2724_s30  ;;  %v1105_v14 = vld [vmem:[%s3689_s5] sm:$0xff] }
 0x2b6   : > { %v730_v38 = vpop.permute.xlu0 %729 }
 0x2b7   : > { %v732_v29 = vsel %vm720_vm1, %v730_v38, %v2945_v22 }
 0x2b9   : > { %965 = vperm.xlu0 %2532, %v961_v15  }
 0x2ca   : > { %v868_v20 = vpop.permute.xlu2 %867 }
 0x2cb   : > { %v871_v60 = vsel %vm720_vm1, %v868_v20, %v3037_v57 }
 0x2cc   : > { %v879_v36 = vmul.f32 %v877_v13, %v871_v60 }
 0x2d2   : > { %v728_v40 = vpop.permute.xlu2 %727 }
 0x2d3   : > { %v731_v31 = vsel %vm720_vm1, %v728_v40, %v2943_v21 }
 0x2db   : > { %v936_v18 = vpop.permute.xlu1 %935 }
 0x2dc   : > { %v940_v19 = vadd.f32 %v936_v18, %v910_v17  ;;  %v1092_v18 = vld [vmem:[%s3688_s4 + $0x8] sm:$0xff] }
 0x2de   : > { %945 = vrot.lane.b32.xlu1 %v940_v19, %s2722_s28  ;;  %v1106_v19 = vld [vmem:[%s3689_s5 + $0x8] sm:$0xff] }
 0x2e3   : > { %v934_v35 = vpop.permute.xlu1 %933 }
 0x2e4   : > { %v939_v37 = vadd.f32 %v934_v35, %v909_v28  ;;  %v2727_v35 = vmov 1.4142135  }
 0x2e5   : > { %2552 = vrcp.f32 %v2727_v35 }
 0x2e6   : > { %953 = vrot.lane.b32.xlu1 %v879_v36, %s2724_s30  ;;  %943 = vrot.lane.b32.xlu2 %v939_v37, %s2722_s28  ;;  %s2461_s30 = smul.u32 5, %s3725_s27 }
 0x2e8   : > { %s571_s27 = scalar_lea.vmem %s3722_s26, %s2461_s30 }
 0x2eb   : > { %v737_v32 = vpop.permute.xlu1 %736  ;;  %v926_v42 = vpop.permute.xlu2 %925 }
 0x2ec   : > { %v740_v43 = vmul.f32 %v737_v32, %v732_v29  ;;  %v739_v44 = vmul.f32 %v737_v32, %v731_v31  ;;  %v2553_v37 = vpop.eup %2552 }
 0x2ed   : > { %vm1126_vm7 = vweird.f32 %v2553_v37 }
 0x2ee   : > { %970 = vperm.xlu2 %2531, %v962_v30  }
 0x2f3   : > { %v886_v39 = vpop.permute.xlu0 %885 }
 0x2f4   : > { %v890_v27 = vadd.f32 %v886_v39, %v740_v43  ;;  %v1122_v39 = vmul.f32 1.4142135, %v2553_v37 }
 0x2f6   : > { %v930_v49 = vadd.f32 %v926_v42, %v890_v27 }
 0x303   : > { %v924_v41 = vpop.permute.xlu0 %923 }
 0x30a   : > { %v884_v57 = vpop.permute.xlu1 %883 }
 0x30b   : > { %v889_v48 = vadd.f32 %v884_v57, %v739_v44  ;;  %v1123_v57 = vsub.f32 1.0, %v1122_v39 }
 0x30d   : > { %v929_v51 = vadd.f32 %v924_v41, %v889_v48  ;;  %v1124_v27 = vmul.f32 %v2553_v37, %v1123_v57 }
 0x323   : > { %v956_v45 = vpop.permute.xlu0 %955 }
 0x32b   : > { %v966_v54 = vpop.permute.xlu0 %965 }
 0x340   : > { %v944_v46 = vpop.permute.xlu2 %943 }
 0x341   : > { %v949_v52 = vadd.f32 %v944_v46, %v929_v51 }
 0x348   : > { %v971_v55 = vpop.permute.xlu2 %970 }
 0x350   : > { %v946_v47 = vpop.permute.xlu1 %945 }
 0x351   : > { %v950_v50 = vadd.f32 %v946_v47, %v930_v49  ;;  %v1125_v47 = vadd.f32 %v2553_v37, %v1124_v27 }
 0x353   : > { %v960_v53 = vadd.f32 %v956_v45, %v950_v50 }
 0x355   : > { %v974_v22 = vadd.f32 %v971_v55, %v960_v53 }
 0x358   : > { %v954_v34 = vpop.permute.xlu1 %953 }
 0x359   : > { %v959_v56 = vadd.f32 %v954_v34, %v949_v52 }
 0x35b   : > { %v973_v58 = vadd.f32 %v966_v54, %v959_v56  ;;  %v3168_v54 = vsel %vm1126_vm7, %v2553_v37, %v1125_v47 }
 0x35d   : > { %v2533_v59 = vpack.i.bf16 %v973_v58, %v974_v22 }
 0x35f   : > { %2534 = vrot.lane.b32.xlu1 %v2533_v59, %s2726_s29 }
 0x3d1   : > { %v2535_v21 = vpop.permute.xlu1 %2534 }
 0x3d2   : > { %v2536_v33 = vunpack.i.l.bf16 %v2535_v21  ;;  %v2537_v61 = vunpack.i.h.bf16 %v2535_v21 }
 0x3d4   : > { %1006 = vmatpush.msra.mxu1 %v2536_v33 }
 0x3d6   : > { %1007 = vmatpush.msra.mxu1 %v2537_v61 }
 0x3d7   : > { %2425 = vmatmul.msk.f32.vlgmr.msra.gmra.mxu1 %vm985_vm2, %v975_v62 }
 0x3df   : > { %2426 = vmatmul.msk.f32.gmra.mxu1 %vm985_vm2, %v976_v63 }
 0x454   : > { %v1009_v0 = vpop.f32.mrf.mxu1 }
 0x455   : > { %v1016_v1 = vsel %vm1015_vm3, %v1009_v0, 0.0 }
 0x456   : > { %1017 = vadd.xlane.f32.xlu1 %v1016_v1 }
 0x45c   : > { %v1012_v2 = vpop.f32.mrf.mxu1 }
 0x45d   : > { %v1019_v3 = vsel %vm1015_vm3, %v1012_v2, 0.0 }
 0x45e   : > { %1020 = vadd.xlane.f32.xlu2 %v1019_v3 }
 0x46f   : > { %1109 = vperm.xlu1 %2543, %v1105_v14  }
 0x476   : > { %1095 = vperm.xlu2 %2531, %v1091_v4  }
 0x4c9   : > { %v1018_v5 = vpop.xlane.xlu1 %1017 }
 0x4ca   : > { %v1022_v6 = vmul.f32 0.015625, %v1018_v5 }
 0x4cc   : > { %v1024_v8 = vsub.f32 %v973_v58, %v1022_v6 }
 0x4ce   : > { %v1026_v10 = vmul.f32 %v1024_v8, %v1024_v8 }
 0x4d1   : > { %v1021_v7 = vpop.xlane.xlu2 %1020 }
 0x4d2   : > { %v1023_v9 = vmul.f32 0.015625, %v1021_v7 }
 0x4d4   : > { %v3150_v24 = vsub.f32 %v974_v22, %v1023_v9 }
 0x4d6   : > { %v1027_v11 = vmul.f32 %v3150_v24, %v3150_v24 }
 0x4d8   : > { %v2538_v25 = vpack.i.bf16 %v1026_v10, %v1027_v11 }
 0x4d9   : > { %v1096_v20 = vpop.permute.xlu2 %1095 }
 0x4da   : > { %2539 = vrot.lane.b32.xlu0 %v2538_v25, %s2726_s29 }
 0x4e1   : > { %v1110_v51 = vpop.permute.xlu1 %1109 }
 0x54c   : > { %v2540_v12 = vpop.permute.xlu0 %2539 }
 0x54d   : > { %v2541_v26 = vunpack.i.l.bf16 %v2540_v12  ;;  %v2542_v13 = vunpack.i.h.bf16 %v2540_v12 }
 0x54f   : > { %1050 = vmatpush.msra.mxu2 %v2541_v26 }
 0x551   : > { %1051 = vmatpush.msra.mxu2 %v2542_v13 }
 0x552   : > { %2427 = vmatmul.msk.f32.vlgmr.msra.gmra.mxu2 %vm985_vm2, %v975_v62 }
 0x55a   : > { %2428 = vmatmul.msk.f32.gmra.mxu2 %vm985_vm2, %v976_v63 }
 0x5d5   : > { %v1053_v15 = vpop.f32.mrf.mxu2 }
 0x5d6   : > { %v1059_v16 = vsel %vm1015_vm3, %v1053_v15, 0.0 }
 0x5d7   : > { %1060 = vadd.xlane.f32.xlu0 %v1059_v16 }
 0x5dd   : > { %v1056_v23 = vpop.f32.mrf.mxu2 }
 0x5de   : > { %v1062_v17 = vsel %vm1015_vm3, %v1056_v23, 0.0 }
 0x5df   : > { %1063 = vadd.xlane.f32.xlu2 %v1062_v17 }
 0x5eb   : > { %1100 = vperm.xlu0 %2532, %v1092_v18  }
 0x5f7   : > { %1114 = vperm.xlu2 %2531, %v1106_v19  }
 0x64a   : > { %v1061_v60 = vpop.xlane.xlu0 %1060 }
 0x64b   : > { %v1065_v28 = vmul.f32 0.015625, %v1061_v60 }
 0x64d   : > { %v1067_v36 = vadd.f32 1e-05, %v1065_v28 }
 0x64f   : > { %2554 = vrsqrt.f32 %v1067_v36  ;;  %vm1075_vm5 = vweird.f32 %v1067_v36 }
 0x652   : > { %v1064_v30 = vpop.xlane.xlu2 %1063 }
 0x653   : > { %v1066_v38 = vmul.f32 0.015625, %v1064_v30 }
 0x655   : > { %v2555_v40 = vpop.eup %2554  ;;  %v1068_v32 = vadd.f32 1e-05, %v1066_v38 }
 0x656   : > { %v1070_v41 = vmul.f32 %v2555_v40, %v1067_v36  ;;  %vm1076_vm4 = vweird.f32 %v2555_v40 }
 0x657   : > { %2556 = vrsqrt.f32 %v1068_v32  ;;  %vm1077_vm6 = vmor %vm1075_vm5, %vm1076_vm4  ;;  %vm1085_vm8 = vweird.f32 %v1068_v32 }
 0x658   : > { %v1071_v42 = vmul.f32 %v2555_v40, %v1070_v41 }
 0x65a   : > { %v1072_v29 = vmul.f32 0.5, %v1071_v42  ;;  %v1115_v62 = vpop.permute.xlu2 %1114 }
 0x65c   : > { %v1073_v43 = vsub.f32 1.5, %v1072_v29 }
 0x65d   : > { %v2557_v31 = vpop.eup %2556  ;;  %v1101_v21 = vpop.permute.xlu0 %1100 }
 0x65e   : > { %v1080_v44 = vmul.f32 %v2557_v31, %v1068_v32  ;;  %v1074_v45 = vmul.f32 %v2555_v40, %v1073_v43  ;;  %vm1086_vm9 = vweird.f32 %v2557_v31 }
 0x65f   : > { %vm1087_vm10 = vmor %vm1085_vm8, %vm1086_vm9 }
 0x660   : > { %v1081_v46 = vmul.f32 %v2557_v31, %v1080_v44  ;;  %v1078_v48 = vsel %vm1077_vm6, %v2555_v40, %v1074_v45 }
 0x661   : > { %v1089_v49 = vmul.f32 %v1078_v48, %v1024_v8 }
 0x662   : > { %v1082_v50 = vmul.f32 0.5, %v1081_v46 }
 0x663   : > { %v1103_v52 = vmul.f32 %v1096_v20, %v1089_v49 }
 0x664   : > { %v1083_v53 = vsub.f32 1.5, %v1082_v50 }
 0x665   : > { %v3170_v55 = vadd.f32 %v1110_v51, %v1103_v52  ;;  %v2728_v52 = vmov -1.0  }
 0x666   : > { %v1084_v34 = vmul.f32 %v2557_v31, %v1083_v53 }
 0x667   : > { %v3174_v56 = vmul.f32 %v3168_v54, %v3170_v55 }
 0x668   : > { %v1088_v22 = vsel %vm1087_vm10, %v2557_v31, %v1084_v34 }
 0x669   : > { %v1090_v58 = vmul.f32 %v1088_v22, %v3150_v24  ;;  %v1134_v59 = vand.u32 2147483647, %v3174_v56  ;;  %vm1130_vm5 = vcmp.ge.f32.partialorder %v3174_v56, 0.0 }
 0x66a   : > { %v1132_v53 = vsel %vm1130_vm5, 1.0, %v2728_v52 }
 0x66b   : > { %v1104_v33 = vmul.f32 %v1101_v21, %v1090_v58  ;;  %v1136_v61 = vmul.f32 0.3275911, %v1134_v59  ;;  %v1188_v13 = vsub.f32 0.0, %v1134_v59  ;;  %v1119_v58 = vmul.f32 0.5, %v3170_v55  ;;  %v1213_v55 = vld [vmem:[#allocation3 + $0x38] sm:$0xff] }
 0x66d   : > { %v3178_v63 = vadd.f32 %v1115_v62, %v1104_v33  ;;  %v1138_v0 = vadd.f32 1.0, %v1136_v61  ;;  %v1190_v20 = vmul.f32 %v1188_v13, %v1134_v59  ;;  %v1206_v13 = vld [vmem:[#allocation3] sm:$0xff] }
 0x66f   : > { %v3182_v1 = vmul.f32 %v3168_v54, %v3178_v63  ;;  %2558 = vrcp.f32 %v1138_v0  ;;  %v1151_v8 = vand.u32 2147483648, %v1138_v0  ;;  %v1149_v24 = vand.u32 2147483647, %v1138_v0 }
 0x670   : > { %vm1145_vm12 = vweird.f32 %v1138_v0  ;;  %v1192_v38 = vmul.f32 1.442695, %v1190_v20 }
 0x671   : > { %v1135_v2 = vand.u32 2147483647, %v3182_v1  ;;  %v1152_v25 = vor.u32 1.1754944e-38, %v1151_v8  ;;  %vm1150_vm14 = vcmp.eq.f32.partialorder %v1149_v24, 8.507059e+37  ;;  %vm1131_vm6 = vcmp.ge.f32.partialorder %v3182_v1, 0.0  ;;  %v1210_v1 = vld [vmem:[#allocation3 + $0x20] sm:$0xff] }
 0x672   : > { %v1228_v8 = vunpack.c.l.bf16 %v1213_v55 }
 0x673   : > { %v1137_v3 = vmul.f32 0.3275911, %v1135_v2  ;;  %v1189_v30 = vsub.f32 0.0, %v1135_v2 }
 0x674   : > { %1248 = vmatpush.msrb.mxu1 %v1228_v8 }
 0x675   : > { %v2559_v4 = vpop.eup %2558  ;;  %v1139_v5 = vadd.f32 1.0, %v1137_v3  ;;  %v1191_v57 = vmul.f32 %v1189_v30, %v1135_v2  ;;  %v1120_v3 = vmul.f32 0.5, %v3178_v63 }
 0x676   : > { %v1141_v6 = vmul.f32 %v2559_v4, %v1138_v0  ;;  %vm1146_vm11 = vweird.f32 %v2559_v4  ;;  %v1133_v0 = vsel %vm1131_vm6, 1.0, %v2728_v52 }
 0x677   : > { %2560 = vrcp.f32 %v1139_v5  ;;  %vm1147_vm13 = vmor %vm1145_vm12, %vm1146_vm11  ;;  %v1166_v23 = vand.u32 2147483648, %v1139_v5  ;;  %v1164_v19 = vand.u32 2147483647, %v1139_v5  ;;  %vm1160_vm0 = vweird.f32 %v1139_v5 }
 0x678   : > { %v1142_v7 = vsub.f32 1.0, %v1141_v6  ;;  %2562 = vpow2.f32 %v1192_v38  ;;  %v1194_v44 = vmul.f32 1.442695, %v1191_v57  ;;  %v1212_v6 = vld [vmem:[#allocation3 + $0x30] sm:$0xff]  ;;  %v1286_v38 = vld [vmem:[%s3693_s9] sm:$0xff] }
 0x679   : > { %v1167_v35 = vor.u32 1.1754944e-38, %v1166_v23  ;;  %vm1165_vm4 = vcmp.eq.f32.partialorder %v1164_v19, 8.507059e+37  ;;  %v1227_v23 = vunpack.c.h.bf16 %v1212_v6  ;;  %v1290_v57 = vld [vmem:[%s3693_s9 + $0x20] sm:$0xff] }
 0x67a   : > { %v1143_v9 = vmul.f32 %v2559_v4, %v1142_v7  ;;  %2564 = vpow2.f32 %v1194_v44  ;;  %v1211_v7 = vld [vmem:[#allocation3 + $0x28] sm:$0xff] }
 0x67b   : > { %v1224_v24 = vunpack.c.l.bf16 %v1211_v7 }
 0x67c   : > { %v1144_v10 = vadd.f32 %v2559_v4, %v1143_v9  ;;  %v1226_v9 = vunpack.c.l.bf16 %v1212_v6 }
 0x67d   : > { %v2561_v11 = vpop.eup %2560 }
 0x67e   : > { %v1156_v12 = vmul.f32 %v2561_v11, %v1139_v5  ;;  %v1148_v26 = vsel %vm1147_vm13, %v2559_v4, %v1144_v10  ;;  %vm1161_vm15 = vweird.f32 %v2561_v11  ;;  %v2563_v47 = vpop.eup %2562  ;;  %v1209_v10 = vld [vmem:[#allocation3 + $0x18] sm:$0xff]  ;;  %1249 = vmatpush.msrb.mxu1 %v1226_v9 }
 0x67f   : > { %v1153_v14 = vsel %vm1150_vm14, %v1152_v25, %v1148_v26  ;;  %vm1162_vm1 = vmor %vm1160_vm0, %vm1161_vm15  ;;  %v1208_v25 = vld [vmem:[#allocation3 + $0x10] sm:$0xff]  ;;  %v1207_v26 = vld [vmem:[#allocation3 + $0x8] sm:$0xff]  ;;  %v1221_v19 = vunpack.c.h.bf16 %v1209_v10 }
 0x680   : > { %v1157_v15 = vsub.f32 1.0, %v1156_v12  ;;  %v1170_v16 = vmul.f32 1.0614054, %v1153_v14  ;;  %v2565_v33 = vpop.eup %2564  ;;  %1250 = vmatpush.msrb.mxu1 %v1224_v24  ;;  %v1220_v12 = vunpack.c.l.bf16 %v1209_v10  ;;  %v1218_v63 = vunpack.c.l.bf16 %v1208_v25 }
 0x681   : > { %v1219_v20 = vunpack.c.h.bf16 %v1208_v25  ;;  %v1414_v10 = vlaneseq }
 0x682   : > { %v1172_v17 = vadd.f32 -1.4531521, %v1170_v16  ;;  %v1158_v18 = vmul.f32 %v2561_v11, %v1157_v15  ;;  %v1214_v15 = vunpack.c.l.bf16 %v1206_v13  ;;  %v1229_v16 = vunpack.c.h.bf16 %v1213_v55 }
 0x683   : > { %v3262_v25 = vand.u32 127, %v1414_v10 }
 0x684   : > { %v1174_v60 = vmul.f32 %v1172_v17, %v1153_v14  ;;  %v1159_v28 = vadd.f32 %v2561_v11, %v1158_v18  ;;  %v1225_v17 = vunpack.c.h.bf16 %v1211_v7  ;;  %v1223_v18 = vunpack.c.h.bf16 %v1210_v1 }
 0x685   : > { %vm1431_vm7 = vcmp.lt.s32.totalorder %v3262_v25, 16  ;;  %vm1463_vm8 = vcmp.lt.s32.totalorder %v3262_v25, 1  ;;  %vm1495_vm9 = vcmp.lt.s32.totalorder %v3262_v25, 113  ;;  %vm1479_vm10 = vcmp.lt.s32.totalorder %v3262_v25, 127 }
 0x686   : > { %v1176_v36 = vadd.f32 1.4214138, %v1174_v60  ;;  %v1163_v37 = vsel %vm1162_vm1, %v2561_v11, %v1159_v28  ;;  %v1222_v11 = vunpack.c.l.bf16 %v1210_v1  ;;  %v1217_v60 = vunpack.c.h.bf16 %v1207_v26 }
 0x687   : > { %v1168_v39 = vsel %vm1165_vm4, %v1167_v35, %v1163_v37  ;;  %v1215_v28 = vunpack.c.h.bf16 %v1206_v13  ;;  %v1435_v13 = vld [vmem:[#allocation5 + $0x1] ss:$8 sm:$0x3]  ;;  %vm1511_vm11 = vcmp.lt.s32.totalorder %v3262_v25, 112  ;;  %vm1527_vm12 = vcmp.lt.s32.totalorder %v3262_v25, 111 }
 0x688   : > { %v1178_v40 = vmul.f32 %v1176_v36, %v1153_v14  ;;  %v1171_v32 = vmul.f32 1.0614054, %v1168_v39  ;;  %1251 = vmatpush.msrb.mxu1 %v1222_v11  ;;  %v3259_v11 = vld [vmem:[#allocation5] ss:$8 sm:$0x3] }
 0x68a   : > { %v1180_v41 = vadd.f32 -0.28449672, %v1178_v40  ;;  %v1173_v42 = vadd.f32 -1.4531521, %v1171_v32  ;;  %1252 = vmatpush.msrb.mxu1 %v1220_v12  ;;  %v1287_v40 = vld [vmem:[%s3693_s9 + $0x8] sm:$0xff] }
 0x68c   : > { %v1182_v29 = vmul.f32 %v1180_v41, %v1153_v14  ;;  %v1175_v43 = vmul.f32 %v1173_v42, %v1168_v39  ;;  %1253 = vmatpush.msrb.mxu1 %v1218_v63  ;;  %v1288_v41 = vld [vmem:[%s3693_s9 + $0x10] sm:$0xff]  ;;  %v1289_v42 = vld [vmem:[%s3693_s9 + $0x18] sm:$0xff]  ;;  %v1451_v63 = vld [vmem:[#allocation5 + $0x2] ss:$8 sm:$0x3] }
 0x68e   : > { %v1184_v27 = vadd.f32 0.2548296, %v1182_v29  ;;  %v1177_v31 = vadd.f32 1.4214138, %v1175_v43  ;;  %v1291_v29 = vld [vmem:[%s3693_s9 + $0x28] sm:$0xff]  ;;  %v1292_v43 = vld [vmem:[%s3693_s9 + $0x30] sm:$0xff] }
 0x690   : > { %v1186_v45 = vmul.f32 %v1184_v27, %v1153_v14  ;;  %v1179_v46 = vmul.f32 %v1177_v31, %v1168_v39  ;;  %v1216_v14 = vunpack.c.l.bf16 %v1207_v26  ;;  %v1293_v27 = vld [vmem:[%s3693_s9 + $0x38] sm:$0xff]  ;;  %v1294_v31 = vld [vmem:[%s3693_s9 + $0x40] sm:$0xff]  ;;  %v1421_v26 = vperm.slane %v3259_v11, 0 }
 0x692   : > { %v1196_v48 = vmul.f32 %v2563_v47, %v1186_v45  ;;  %v1181_v49 = vadd.f32 -0.28449672, %v1179_v46  ;;  %1254 = vmatpush.msrb.mxu1 %v1216_v14  ;;  %v1467_v14 = vld [vmem:[#allocation5 + $0x3] ss:$8 sm:$0x3] }
 0x694   : > { %v1198_v50 = vsub.f32 1.0, %v1196_v48  ;;  %v1183_v51 = vmul.f32 %v1181_v49, %v1168_v39  ;;  %1255 = vmatpush.msrb.mxu1 %v1214_v15 }
 0x696   : > { %v1200_v34 = vmul.f32 %v1198_v50, %v1132_v53  ;;  %v1185_v22 = vadd.f32 0.2548296, %v1183_v51  ;;  %1271 = vmatpush.msra.mxu1 %v1229_v16  ;;  %v1422_v16 = vperm.slane %v3259_v11, 1 }
 0x698   : > { %v1202_v59 = vadd.f32 1.0, %v1200_v34  ;;  %v1187_v21 = vmul.f32 %v1185_v22, %v1168_v39  ;;  %1272 = vmatpush.msra.mxu1 %v1227_v23  ;;  %v1499_v23 = vld [vmem:[#allocation5 + $0x6] ss:$8 sm:$0x3] }
 0x69a   : > { %v1204_v61 = vmul.f32 %v1202_v59, %v1119_v58  ;;  %v1197_v62 = vmul.f32 %v2565_v33, %v1187_v21  ;;  %1273 = vmatpush.msra.mxu1 %v1225_v17  ;;  %v1453_v17 = vperm.slane %v1451_v63, 0 }
 0x69c   : > { %1232 = vrot.lane.b32.xlu1 %v1204_v61, %s2726_s29  ;;  %v1199_v56 = vsub.f32 1.0, %v1197_v62  ;;  %1274 = vmatpush.msra.mxu1 %v1223_v18  ;;  %v1454_v18 = vperm.slane %v1451_v63, 1 }
 0x69e   : > { %v1201_v2 = vmul.f32 %v1199_v56, %v1133_v0  ;;  %1275 = vmatpush.msra.mxu1 %v1221_v19  ;;  %v1555_v56 = vld [vmem:[%s3694_s10] sm:$0xff] }
 0x6a0   : > { %v1203_v4 = vadd.f32 1.0, %v1201_v2  ;;  %1276 = vmatpush.msra.mxu1 %v1219_v20  ;;  %v1588_v2 = vld [vmem:[%s3695_s11] sm:$0xff] }
 0x6a1   : > { %v1483_v20 = vld [vmem:[#allocation5 + $0x5] ss:$8 sm:$0x3] }
 0x6a2   : > { %v1205_v5 = vmul.f32 %v1203_v4, %v1120_v3  ;;  %1277 = vmatpush.msra.mxu1 %v1217_v60  ;;  %v1596_v3 = vld [vmem:[%s3696_s12] sm:$0xff]  ;;  %v1437_v60 = vperm.slane %v1435_v13, 0 }
 0x6a3   : > { %v1985_v4 = vld [vmem:[#allocation2] sm:$0x1] }
 0x6a4   : > { %1234 = vrot.lane.b32.xlu2 %v1205_v5, %s2726_s29  ;;  %1278 = vmatpush.msra.mxu1 %v1215_v28  ;;  %s2730_s29 = smov 16   ;;  %v1438_v28 = vperm.slane %v1435_v13, 1 }
 0x6fe   : > { %v1235_v36 = vpop.permute.xlu2 %1234 }
 0x70e   : > { %v1233_v35 = vpop.permute.xlu1 %1232 }
 0x70f   : > { %2429 = vmatmul.msk.f32.vlgmr.msrb.gmra.mxu1 %vm1015_vm3, %v1233_v35 }
 0x717   : > { %2430 = vmatmul.msk.f32.gmra.mxu1 %vm1015_vm3, %v1235_v36 }
 0x71f   : > { %2431 = vmatmul.msk.f32.vlgmr.msra.gmra.mxu1 %vm1015_vm3, %v1233_v35  ;;  %v1469_v35 = vperm.slane %v1467_v14, 0 }
 0x727   : > { %2432 = vmatmul.msk.f32.gmra.mxu1 %vm1015_vm3, %v1235_v36  ;;  %vm1447_vm3 = vcmp.lt.s32.totalorder %v3262_v25, 15  ;;  %v1470_v36 = vperm.slane %v1467_v14, 1 }
 0x78c   : > { %v1257_v37 = vpop.f32.mrf.mxu1 }
 0x794   : > { %v1260_v30 = vpop.f32.mrf.mxu1 }
 0x795   : > { %1336 = vmatpush.msrb.mxu2 %v1260_v30 }
 0x797   : > { %1337 = vmatpush.msrb.mxu2 %v1257_v37  ;;  %v1501_v37 = vperm.slane %v1499_v23, 0 }
 0x798   : > { %2433 = vmatmul.msk.f32.vlgmr.msrb.gmra.mxu2 %vm985_vm2, %v1286_v38 }
 0x79c   : > { %v1280_v39 = vpop.f32.mrf.mxu1 }
 0x7a0   : > { %2434 = vmatmul.msk.f32.gmra.mxu2 %vm985_vm2, %v1287_v40 }
 0x7a4   : > { %v1283_v32 = vpop.f32.mrf.mxu1 }
 0x7a5   : > { %1380 = vmatpush.msra.mxu3 %v1283_v32  ;;  %v1515_v32 = vld [vmem:[#allocation5 + $0x7] ss:$8 sm:$0x3] }
 0x7a7   : > { %1381 = vmatpush.msra.mxu3 %v1280_v39  ;;  %v1502_v39 = vperm.slane %v1499_v23, 1 }
 0x7a8   : > { %2435 = vmatmul.msk.f32.gmra.mxu2 %vm985_vm2, %v1288_v41  ;;  %2442 = vmatmul.msk.f32.vlgmr.msra.gmra.mxu3 %vm985_vm2, %v1286_v38 }
 0x7b0   : > { %2436 = vmatmul.msk.f32.gmra.mxu2 %vm985_vm2, %v1289_v42  ;;  %2443 = vmatmul.msk.f32.gmra.mxu3 %vm985_vm2, %v1287_v40  ;;  %v1485_v40 = vperm.slane %v1483_v20, 0 }
 0x7b8   : > { %2437 = vmatmul.msk.f32.gmra.mxu2 %vm985_vm2, %v1290_v57  ;;  %2444 = vmatmul.msk.f32.gmra.mxu3 %vm985_vm2, %v1288_v41 }
 0x7c0   : > { %2438 = vmatmul.msk.f32.gmra.mxu2 %vm985_vm2, %v1291_v29  ;;  %2445 = vmatmul.msk.f32.gmra.mxu3 %vm985_vm2, %v1289_v42 }
 0x7c8   : > { %2439 = vmatmul.msk.f32.gmra.mxu2 %vm985_vm2, %v1292_v43  ;;  %2446 = vmatmul.msk.f32.gmra.mxu3 %vm985_vm2, %v1290_v57 }
 0x7d0   : > { %2447 = vmatmul.msk.f32.gmra.mxu3 %vm985_vm2, %v1291_v29  ;;  %2440 = vmatmul.msk.f32.gmra.mxu2 %vm985_vm2, %v1293_v27  ;;  %v1486_v29 = vperm.slane %v1483_v20, 1 }
 0x7d8   : > { %2448 = vmatmul.msk.f32.gmra.mxu3 %vm985_vm2, %v1292_v43  ;;  %2441 = vmatmul.msk.f32.gmra.mxu2 %vm985_vm2, %v1294_v31 }
 0x7e0   : > { %2449 = vmatmul.msk.f32.gmra.mxu3 %vm985_vm2, %v1293_v27 }
 0x7e8   : > { %2450 = vmatmul.msk.f32.gmra.mxu3 %vm985_vm2, %v1294_v31  ;;  %vm1416_vm2 = vcmp.lt.s32.totalorder %v3262_v25, 17 }
 0x81b   : > { %v1339_v44 = vpop.f32.mrf.mxu2 }
 0x81c   : > { %1410 = vrot.lane.b32.xlu1 %v1339_v44, %s2729_s15 }
 0x823   : > { %v1342_v45 = vpop.f32.mrf.mxu2 }
 0x824   : > { %1427 = vrot.lane.b32.xlu2 %v1342_v45, %s2730_s29 }
 0x82b   : > { %v1345_v46 = vpop.f32.mrf.mxu2  ;;  %v1383_v47 = vpop.f32.mrf.mxu3 }
 0x82c   : > { %1412 = vrot.lane.b32.xlu0 %v1383_v47, %s2729_s15 }
 0x833   : > { %v1348_v48 = vpop.f32.mrf.mxu2  ;;  %v1386_v49 = vpop.f32.mrf.mxu3 }
 0x834   : > { %1443 = vrot.lane.b32.xlu0 %v1345_v46, %s2731_s17  ;;  %1429 = vrot.lane.b32.xlu1 %v1386_v49, %s2730_s29  ;;  %v1518_v49 = vperm.slane %v1515_v32, 1 }
 0x83b   : > { %v3242_v50 = vpop.f32.mrf.mxu2  ;;  %v1389_v51 = vpop.f32.mrf.mxu3 }
 0x83c   : > { %1445 = vrot.lane.b32.xlu2 %v1389_v51, %s2731_s17  ;;  %1459 = vrot.lane.b32.xlu1 %v1348_v48, %s2715_s0  ;;  %v1517_v48 = vperm.slane %v1515_v32, 0 }
 0x843   : > { %v1354_v53 = vpop.f32.mrf.mxu2  ;;  %v1392_v34 = vpop.f32.mrf.mxu3 }
 0x844   : > { %1461 = vrot.lane.b32.xlu0 %v1392_v34, %s2715_s0  ;;  %1475 = vrot.lane.b32.xlu2 %v1354_v53, %s2716_s7 }
 0x84b   : > { %v1357_v22 = vpop.f32.mrf.mxu2  ;;  %v3247_v58 = vpop.f32.mrf.mxu3 }
 0x84c   : > { %1491 = vrot.lane.b32.xlu0 %v1357_v22, %s2732_s18 }
 0x853   : > { %v1398_v59 = vpop.f32.mrf.mxu3  ;;  %v1360_v21 = vpop.f32.mrf.mxu2 }
 0x854   : > { %1477 = vrot.lane.b32.xlu1 %v1398_v59, %s2716_s7 }
 0x85b   : > { %v1401_v33 = vpop.f32.mrf.mxu3  ;;  %v1363_v61 = vpop.f32.mrf.mxu2 }
 0x85c   : > { %1493 = vrot.lane.b32.xlu2 %v1401_v33, %s2732_s18  ;;  %1507 = vrot.lane.b32.xlu1 %v1360_v21, %s2733_s19 }
 0x863   : > { %v1404_v62 = vpop.f32.mrf.mxu3 }
 0x864   : > { %1509 = vrot.lane.b32.xlu0 %v1404_v62, %s2733_s19  ;;  %1523 = vrot.lane.b32.xlu2 %v1363_v61, %s2734_s20 }
 0x86b   : > { %v1407_v0 = vpop.f32.mrf.mxu3 }
 0x86c   : > { %1558 = vperm.xlu0 %2532, %v1555_v56   ;;  %1525 = vrot.lane.b32.xlu1 %v1407_v0, %s2734_s20 }
 0x874   : > { %1591 = vperm.xlu0 %2532, %v1588_v2  }
 0x87c   : > { %1599 = vperm.xlu0 %2532, %v1596_v3  }
 0x87e   : > { %v1428_v6 = vpop.permute.xlu2 %1427 }
 0x884   : > { %1988 = vperm.xlu0 %2532, %v1985_v4  }
 0x88e   : > { %v1411_v5 = vpop.permute.xlu1 %1410 }
 0x896   : > { %v1446_v9 = vpop.permute.xlu2 %1445 }
 0x89e   : > { %v1413_v55 = vpop.permute.xlu0 %1412  ;;  %v1476_v12 = vpop.permute.xlu2 %1475 }
 0x89f   : > { %v1417_v30 = vsel %vm1416_vm2, %v1411_v5, %v1413_v55  ;;  %v1418_v38 = vsel %vm1416_vm2, %v1413_v55, %v1411_v5 }
 0x8a6   : > { %v1444_v7 = vpop.permute.xlu0 %1443  ;;  %v1430_v8 = vpop.permute.xlu1 %1429 }
 0x8a7   : > { %v1448_v41 = vsel %vm1447_vm3, %v1444_v7, %v1446_v9  ;;  %v1449_v43 = vsel %vm1447_vm3, %v1446_v9, %v1444_v7  ;;  %v1432_v27 = vsel %vm1431_vm7, %v1428_v6, %v1430_v8  ;;  %v1433_v45 = vsel %vm1431_vm7, %v1430_v8, %v1428_v6 }
 0x8a8   : > { %v1457_v59 = vmul.f32 %v1453_v17, %v1449_v43  ;;  %v1458_v21 = vmul.f32 %v1454_v18, %v1448_v41  ;;  %v1441_v56 = vmul.f32 %v1437_v60, %v1433_v45  ;;  %v1442_v0 = vmul.f32 %v1438_v28, %v1432_v27 }
 0x8a9   : > { %v1425_v7 = vmul.f32 %v1421_v26, %v1418_v38  ;;  %v1426_v8 = vmul.f32 %v1422_v16, %v1417_v30 }
 0x8ab   : > { %v1539_v14 = vadd.f32 %v1441_v56, %v1425_v7 }
 0x8ae   : > { %v1460_v1 = vpop.permute.xlu1 %1459 }
 0x8b6   : > { %v1462_v24 = vpop.permute.xlu0 %1461  ;;  %v1494_v46 = vpop.permute.xlu2 %1493 }
 0x8b7   : > { %v1464_v42 = vsel %vm1463_vm8, %v1460_v1, %v1462_v24  ;;  %v1465_v57 = vsel %vm1463_vm8, %v1462_v24, %v1460_v1  ;;  %v1531_v24 = vld [vmem:[#allocation5 + $0x10] ss:$8 sm:$0x3] }
 0x8b8   : > { %v1473_v51 = vmul.f32 %v1469_v35, %v1465_v57  ;;  %v1474_v53 = vmul.f32 %v1470_v36, %v1464_v42  ;;  %v1534_v20 = vperm.slane %v1531_v24, 1 }
 0x8ba   : > { %v1541_v9 = vadd.f32 %v1473_v51, %v1457_v59  ;;  %v1542_v1 = vadd.f32 %v1474_v53, %v1458_v21 }
 0x8bc   : > { %v1547_v26 = vadd.f32 %v1541_v9, %v1539_v14 }
 0x8be   : > { %v1492_v19 = vpop.permute.xlu0 %1491  ;;  %v1524_v18 = vpop.permute.xlu2 %1523 }
 0x8bf   : > { %v1496_v34 = vsel %vm1495_vm9, %v1492_v19, %v1494_v46  ;;  %v1497_v22 = vsel %vm1495_vm9, %v1494_v46, %v1492_v19  ;;  %v1533_v19 = vperm.slane %v1531_v24, 0 }
 0x8c0   : > { %v1505_v4 = vmul.f32 %v1501_v37, %v1496_v34  ;;  %v1506_v5 = vmul.f32 %v1502_v39, %v1497_v22 }
 0x8c6   : > { %v1478_v15 = vpop.permute.xlu1 %1477 }
 0x8c7   : > { %v1480_v31 = vsel %vm1479_vm10, %v1476_v12, %v1478_v15  ;;  %v1481_v44 = vsel %vm1479_vm10, %v1478_v15, %v1476_v12  ;;  %v1540_v15 = vadd.f32 %v1442_v0, %v1426_v8  ;;  %vm1685_vm10 = vcmask 64512  }
 0x8c8   : > { %v1489_v33 = vmul.f32 %v1485_v40, %v1480_v31  ;;  %v1490_v61 = vmul.f32 %v1486_v29, %v1481_v44 }
 0x8c9   : > { %v1548_v16 = vadd.f32 %v1542_v1, %v1540_v15 }
 0x8ca   : > { %v1543_v11 = vadd.f32 %v1489_v33, %v3242_v50  ;;  %v1544_v12 = vadd.f32 %v1490_v61, %v3247_v58 }
 0x8ce   : > { %v1508_v47 = vpop.permute.xlu1 %1507 }
 0x8d6   : > { %v1510_v62 = vpop.permute.xlu0 %1509 }
 0x8d7   : > { %v1512_v2 = vsel %vm1511_vm11, %v1508_v47, %v1510_v62  ;;  %v1513_v3 = vsel %vm1511_vm11, %v1510_v62, %v1508_v47 }
 0x8d8   : > { %v1521_v55 = vmul.f32 %v1517_v48, %v1512_v2  ;;  %v1522_v6 = vmul.f32 %v1518_v49, %v1513_v3 }
 0x8da   : > { %v1545_v63 = vadd.f32 %v1521_v55, %v1505_v4  ;;  %v1546_v13 = vadd.f32 %v1522_v6, %v1506_v5 }
 0x8dc   : > { %v1549_v23 = vadd.f32 %v1545_v63, %v1543_v11  ;;  %v1550_v17 = vadd.f32 %v1546_v13, %v1544_v12 }
 0x8de   : > { %v1526_v60 = vpop.permute.xlu1 %1525  ;;  %v1551_v36 = vadd.f32 %v1549_v23, %v1547_v26  ;;  %v1552_v50 = vadd.f32 %v1550_v17, %v1548_v16  ;;  %v1559_v39 = vpop.permute.xlu0 %1558 }
 0x8df   : > { %v1528_v28 = vsel %vm1527_vm12, %v1524_v18, %v1526_v60  ;;  %v1529_v35 = vsel %vm1527_vm12, %v1526_v60, %v1524_v18 }
 0x8e0   : > { %v1537_v37 = vmul.f32 %v1533_v19, %v1528_v28  ;;  %v1538_v58 = vmul.f32 %v1534_v20, %v1529_v35 }
 0x8e2   : > { %v1553_v30 = vadd.f32 %v1551_v36, %v1537_v37  ;;  %v1554_v38 = vadd.f32 %v1552_v50, %v1538_v58 }
 0x8e4   : > { %v1561_v40 = vadd.f32 %v1559_v39, %v1553_v30  ;;  %v1562_v32 = vadd.f32 %v1559_v39, %v1554_v38 }
 0x8e6   : > { %v1563_v25 = vadd.f32 %v1562_v32, %v1561_v40  ;;  %v1592_v51 = vpop.permute.xlu0 %1591 }
 0x8e8   : > { %1564 = vadd.xlane.f32.xlu2 %v1563_v25 }
 0x8ee   : > { %v1600_v56 = vpop.permute.xlu0 %1599 }
 0x95b   : > { %v1565_v41 = vpop.xlane.xlu2 %1564 }
 0x95c   : > { %v1566_v42 = vmul.f32 0.00390625, %v1565_v41 }
 0x95e   : > { %v1567_v57 = vsub.f32 %v1561_v40, %v1566_v42  ;;  %v1568_v29 = vsub.f32 %v1562_v32, %v1566_v42  ;;  %v3314_v42 = vld [vmem:[#allocation7 + $0x274] sm:$0xff] }
 0x960   : > { %v1569_v43 = vmul.f32 %v1567_v57, %v1567_v57  ;;  %v1570_v27 = vmul.f32 %v1568_v29, %v1568_v29 }
 0x962   : > { %v1571_v31 = vadd.f32 %v1570_v27, %v1569_v43  ;;  %v3317_v43 = vld [vmem:[#allocation7 + $0x260] sm:$0xff]  ;;  %v3319_v27 = vld [vmem:[#allocation7 + $0x12c] sm:$0xff] }
 0x964   : > { %1572 = vadd.xlane.f32.xlu1 %v1571_v31  ;;  %v3321_v31 = vld [vmem:[#allocation7 + $0x118] sm:$0xff] }
 0x9d7   : > { %v1573_v44 = vpop.xlane.xlu1 %1572 }
 0x9d8   : > { %v1574_v45 = vmul.f32 0.00390625, %v1573_v44 }
 0x9da   : > { %v1575_v46 = vadd.f32 1e-05, %v1574_v45 }
 0x9dc   : > { %2566 = vrsqrt.f32 %v1575_v46  ;;  %vm1582_vm14 = vweird.f32 %v1575_v46 }
 0x9e2   : > { %v2567_v47 = vpop.eup %2566 }
 0x9e3   : > { %v1577_v48 = vmul.f32 %v2567_v47, %v1575_v46  ;;  %vm1583_vm13 = vweird.f32 %v2567_v47  ;;  %v1978_v46 = vunpack.c.h.bf16 %v3317_v43 }
 0x9e4   : > { %vm1584_vm15 = vmor %vm1582_vm14, %vm1583_vm13 }
 0x9e5   : > { %v1578_v49 = vmul.f32 %v2567_v47, %v1577_v48  ;;  %v3326_v48 = vld [vmem:[#allocation7 + $0x104] sm:$0xff] }
 0x9e7   : > { %v1579_v53 = vmul.f32 0.5, %v1578_v49 }
 0x9e9   : > { %v1580_v34 = vsub.f32 1.5, %v1579_v53 }
 0x9eb   : > { %v1581_v22 = vmul.f32 %v2567_v47, %v1580_v34  ;;  %v1901_v34 = vunpack.c.h.bf16 %v3319_v27 }
 0x9ed   : > { %v1585_v59 = vsel %vm1584_vm15, %v2567_v47, %v1581_v22  ;;  %v3324_v47 = vld [vmem:[#allocation7 + $0x24c] sm:$0xff]  ;;  %2032 = vmatpush.msrb.mxu3 %v1901_v34 }
 0x9ee   : > { %v1586_v21 = vmul.f32 %v1585_v59, %v1567_v57  ;;  %v1587_v33 = vmul.f32 %v1585_v59, %v1568_v29  ;;  %v1983_v29 = vunpack.c.h.bf16 %v3314_v42  ;;  %v1973_v53 = vunpack.c.h.bf16 %v3324_v47  ;;  %v3331_v22 = vld [vmem:[#allocation7 + $0x26c] sm:$0xff] }
 0x9f0   : > { %v1594_v61 = vmul.f32 %v1592_v51, %v1586_v21  ;;  %v1595_v62 = vmul.f32 %v1592_v51, %v1587_v33  ;;  %2132 = vmatpush.msrb.mxu0 %v1983_v29  ;;  %v1896_v21 = vunpack.c.h.bf16 %v3321_v31  ;;  %v3335_v33 = vld [vmem:[#allocation7 + $0xf0] sm:$0xff] }
 0x9f2   : > { %v3292_v0 = vadd.f32 %v1600_v56, %v1594_v61  ;;  %v3294_v2 = vadd.f32 %v1600_v56, %v1595_v62  ;;  %2133 = vmatpush.msrb.mxu0 %v1978_v46  ;;  %v1891_v62 = vunpack.c.h.bf16 %v3326_v48  ;;  %v3338_v56 = vld [vmem:[#allocation7 + $0x238] sm:$0xff]  ;;  %2033 = vmatpush.msrb.mxu3 %v1896_v21 }
 0x9f4   : > { %v3298_v3 = vmul.f32 %v3292_v0, %v3168_v54  ;;  %v3302_v4 = vmul.f32 %v3294_v2, %v3168_v54  ;;  %2134 = vmatpush.msrb.mxu0 %v1973_v53  ;;  %2034 = vmatpush.msrb.mxu3 %v1891_v62  ;;  %v3391_v53 = vld [vmem:[#allocation7 + $0x1e0] sm:$0xff] }
 0x9f5   : > { %v1945_v21 = vunpack.c.l.bf16 %v3391_v53 }
 0x9f6   : > { %v1612_v5 = vand.u32 2147483647, %v3298_v3  ;;  %v1613_v55 = vand.u32 2147483647, %v3302_v4  ;;  %vm1608_vm8 = vcmp.ge.f32.partialorder %v3298_v3, 0.0  ;;  %vm1609_vm9 = vcmp.ge.f32.partialorder %v3302_v4, 0.0 }
 0x9f7   : > { %v3381_v3 = vld [vmem:[#allocation7 + $0x1f4] sm:$0xff]  ;;  %v1605_v4 = vmul.f32 0.5, %v3294_v2 }
 0x9f8   : > { %v1614_v6 = vmul.f32 0.3275911, %v1612_v5  ;;  %v1615_v7 = vmul.f32 0.3275911, %v1613_v55  ;;  %v1666_v35 = vsub.f32 0.0, %v1612_v5  ;;  %v1667_v58 = vsub.f32 0.0, %v1613_v55 }
 0x9fa   : > { %v1616_v8 = vadd.f32 1.0, %v1614_v6  ;;  %v1617_v9 = vadd.f32 1.0, %v1615_v7  ;;  %v1668_v39 = vmul.f32 %v1666_v35, %v1612_v5  ;;  %v1669_v25 = vmul.f32 %v1667_v58, %v1613_v55  ;;  %v3340_v5 = vld [vmem:[#allocation7 + $0x258] sm:$0xff] }
 0x9fb   : > { %v1968_v6 = vunpack.c.h.bf16 %v3338_v56  ;;  %v3343_v7 = vld [vmem:[#allocation7 + $0xdc] sm:$0xff] }
 0x9fc   : > { %2568 = vrcp.f32 %v1616_v8  ;;  %v1629_v13 = vand.u32 2147483648, %v1616_v8  ;;  %v1627_v54 = vand.u32 2147483647, %v1616_v8  ;;  %v1644_v23 = vand.u32 2147483648, %v1617_v9 }
 0x9fd   : > { %2570 = vrcp.f32 %v1617_v9  ;;  %v1642_v18 = vand.u32 2147483647, %v1617_v9  ;;  %vm1623_vm4 = vweird.f32 %v1616_v8  ;;  %vm1638_vm6 = vweird.f32 %v1617_v9  ;;  %2135 = vmatpush.msrb.mxu0 %v1968_v6  ;;  %v3398_v6 = vld [vmem:[#allocation7 + $0x1cc] sm:$0xff] }
 0x9fe   : > { %v1630_v20 = vor.u32 1.1754944e-38, %v1629_v13  ;;  %vm1628_vm2 = vcmp.eq.f32.partialorder %v1627_v54, 8.507059e+37  ;;  %v1645_v60 = vor.u32 1.1754944e-38, %v1644_v23  ;;  %v1670_v44 = vmul.f32 1.442695, %v1668_v39  ;;  %v3356_v54 = vld [vmem:[#allocation7 + $0x230] sm:$0xff] }
 0x9ff   : > { %vm1643_vm7 = vcmp.eq.f32.partialorder %v1642_v18, 8.507059e+37  ;;  %v1672_v51 = vmul.f32 1.442695, %v1669_v25  ;;  %v1965_v18 = vunpack.c.l.bf16 %v3356_v54  ;;  %v3374_v39 = vld [vmem:[#allocation7 + $0x208] sm:$0xff] }
 0xa00   : > { %2572 = vpow2.f32 %v1670_v44  ;;  %v3384_v44 = vld [vmem:[#allocation7 + $0x78] sm:$0xff] }
 0xa01   : > { %2574 = vpow2.f32 %v1672_v51 }
 0xa02   : > { %v2569_v1 = vpop.eup %2568 }
 0xa03   : > { %v2571_v24 = vpop.eup %2570  ;;  %v1619_v11 = vmul.f32 %v2569_v1, %v1616_v8  ;;  %vm1624_vm0 = vweird.f32 %v2569_v1  ;;  %v1980_v8 = vunpack.c.l.bf16 %v3331_v22 }
 0xa04   : > { %v1634_v12 = vmul.f32 %v2571_v24, %v1617_v9  ;;  %vm1639_vm1 = vweird.f32 %v2571_v24  ;;  %vm1625_vm5 = vmor %vm1623_vm4, %vm1624_vm0 }
 0xa05   : > { %v1620_v63 = vsub.f32 1.0, %v1619_v11  ;;  %vm1640_vm3 = vmor %vm1638_vm6, %vm1639_vm1  ;;  %v3349_v11 = vld [vmem:[#allocation7 + $0x244] sm:$0xff]  ;;  %2012 = vmatpush.msra.mxu2 %v1980_v8 }
 0xa06   : > { %v1635_v14 = vsub.f32 1.0, %v1634_v12  ;;  %v1970_v13 = vunpack.c.l.bf16 %v3349_v11 }
 0xa07   : > { %v1621_v15 = vmul.f32 %v2569_v1, %v1620_v63  ;;  %v3352_v63 = vld [vmem:[#allocation7 + $0xc8] sm:$0xff] }
 0xa08   : > { %v1636_v17 = vmul.f32 %v2571_v24, %v1635_v14 }
 0xa09   : > { %v1622_v19 = vadd.f32 %v2569_v1, %v1621_v15  ;;  %v1881_v15 = vunpack.c.h.bf16 %v3343_v7 }
 0xa0a   : > { %v1637_v26 = vadd.f32 %v2571_v24, %v1636_v17  ;;  %v3358_v17 = vld [vmem:[#allocation7 + $0xb4] sm:$0xff] }
 0xa0b   : > { %v1626_v16 = vsel %vm1625_vm5, %v2569_v1, %v1622_v19  ;;  %v1886_v1 = vunpack.c.h.bf16 %v3335_v33 }
 0xa0c   : > { %v3306_v28 = vsel %vm1628_vm2, %v1630_v20, %v1626_v16  ;;  %v1641_v36 = vsel %vm1640_vm3, %v2571_v24, %v1637_v26  ;;  %v1975_v24 = vunpack.c.l.bf16 %v3340_v5  ;;  %v1876_v20 = vunpack.c.h.bf16 %v3352_v63  ;;  %v3363_v26 = vld [vmem:[#allocation7 + $0x21c] sm:$0xff]  ;;  %v3365_v16 = vld [vmem:[#allocation7 + $0x224] sm:$0xff] }
 0xa0d   : > { %v1648_v50 = vmul.f32 1.0614054, %v3306_v28  ;;  %v3309_v37 = vsel %vm1643_vm7, %v1645_v60, %v1641_v36  ;;  %2035 = vmatpush.msrb.mxu3 %v1886_v1  ;;  %v2573_v60 = vpop.eup %2572  ;;  %v3368_v36 = vld [vmem:[#allocation7 + $0xa0] sm:$0xff]  ;;  %v1963_v58 = vunpack.c.h.bf16 %v3365_v16  ;;  %v1940_v1 = vunpack.c.l.bf16 %v3398_v6 }
 0xa0e   : > { %v1649_v30 = vmul.f32 1.0614054, %v3309_v37  ;;  %2013 = vmatpush.msra.mxu2 %v1975_v24 }
 0xa0f   : > { %v1650_v38 = vadd.f32 -1.4531521, %v1648_v50  ;;  %v1960_v50 = vunpack.c.l.bf16 %v3363_v26  ;;  %2036 = vmatpush.msrb.mxu3 %v1881_v15  ;;  %2136 = vmatpush.msrb.mxu0 %v1963_v58  ;;  %v1900_v15 = vunpack.c.l.bf16 %v3319_v27  ;;  %v3426_v58 = vld [vmem:[#allocation7 + $0x190] sm:$0xff] }
 0xa10   : > { %v1651_v40 = vadd.f32 -1.4531521, %v1649_v30  ;;  %2014 = vmatpush.msra.mxu2 %v1970_v13  ;;  %v2575_v30 = vpop.eup %2574 }
 0xa11   : > { %v1652_v32 = vmul.f32 %v1650_v38, %v3306_v28  ;;  %v1871_v38 = vunpack.c.h.bf16 %v3358_v17  ;;  %2037 = vmatpush.msrb.mxu3 %v1876_v20  ;;  %v3418_v20 = vld [vmem:[#allocation7 + $0x1a4] sm:$0xff] }
 0xa12   : > { %v1653_v41 = vmul.f32 %v1651_v40, %v3309_v37  ;;  %2015 = vmatpush.msra.mxu2 %v1965_v18  ;;  %v1930_v27 = vunpack.c.l.bf16 %v3418_v20 }
 0xa13   : > { %v1654_v57 = vadd.f32 1.4214138, %v1652_v32  ;;  %v1955_v32 = vunpack.c.l.bf16 %v3374_v39  ;;  %2038 = vmatpush.msrb.mxu3 %v1871_v38  ;;  %v1925_v38 = vunpack.c.l.bf16 %v3426_v58 }
 0xa14   : > { %v1655_v45 = vadd.f32 1.4214138, %v1653_v41  ;;  %v1866_v41 = vunpack.c.h.bf16 %v3368_v36  ;;  %2016 = vmatpush.msra.mxu2 %v1960_v50 }
 0xa15   : > { %v1656_v49 = vmul.f32 %v1654_v57, %v3306_v28  ;;  %v1610_v57 = vsel %vm1608_vm8, 1.0, %v2728_v52 }
 0xa16   : > { %v1657_v59 = vmul.f32 %v1655_v45, %v3309_v37  ;;  %v1950_v45 = vunpack.c.l.bf16 %v3381_v3  ;;  %2017 = vmatpush.msra.mxu2 %v1955_v32  ;;  %2039 = vmatpush.msrb.mxu3 %v1866_v41  ;;  %v3435_v32 = vld [vmem:[#allocation7] sm:$0xff]  ;;  %v3438_v41 = vld [vmem:[#allocation7 + $0x168] sm:$0xff] }
 0xa17   : > { %v1658_v61 = vadd.f32 -0.28449672, %v1656_v49  ;;  %v1611_v49 = vsel %vm1609_vm9, 1.0, %v2728_v52  ;;  %v3400_v52 = vld [vmem:[#allocation7 + $0x210] sm:$0xff] }
 0xa18   : > { %v1659_v55 = vadd.f32 -0.28449672, %v1657_v59  ;;  %v3393_v59 = vld [vmem:[#allocation7 + $0x64] sm:$0xff]  ;;  %2018 = vmatpush.msra.mxu2 %v1950_v45  ;;  %v1958_v24 = vunpack.c.h.bf16 %v3400_v52 }
 0xa19   : > { %v1660_v9 = vmul.f32 %v1658_v61, %v3306_v28  ;;  %v1604_v61 = vmul.f32 0.5, %v3292_v0  ;;  %v1684_v0 = vld [vmem:[%s3698_s14] sm:$0x1]  ;;  %v1851_v13 = vunpack.c.h.bf16 %v3393_v59 }
 0xa1a   : > { %v1661_v12 = vmul.f32 %v1659_v55, %v3309_v37  ;;  %v1856_v55 = vunpack.c.h.bf16 %v3384_v44  ;;  %2019 = vmatpush.msra.mxu2 %v1945_v21  ;;  %2137 = vmatpush.msrb.mxu0 %v1958_v24  ;;  %v3463_v24 = vld [vmem:[#allocation7 + $0x120] sm:$0xff] }
 0xa1b   : > { %v1662_v14 = vadd.f32 0.2548296, %v1660_v9  ;;  %v3403_v9 = vld [vmem:[#allocation7 + $0x50] sm:$0xff] }
 0xa1c   : > { %v1663_v23 = vadd.f32 0.2548296, %v1661_v12  ;;  %2020 = vmatpush.msra.mxu2 %v1940_v1  ;;  %v1972_v1 = vunpack.c.l.bf16 %v3324_v47 }
 0xa1d   : > { %v1664_v19 = vmul.f32 %v1662_v14, %v3306_v28  ;;  %v3411_v14 = vld [vmem:[#allocation7 + $0x1b8] sm:$0xff] }
 0xa1e   : > { %v1665_v35 = vmul.f32 %v1663_v23, %v3309_v37  ;;  %v3377_v37 = vld [vmem:[#allocation7 + $0x8c] sm:$0xff]  ;;  %v3414_v23 = vld [vmem:[#allocation7 + $0x3c] sm:$0xff]  ;;  %v1935_v18 = vunpack.c.l.bf16 %v3411_v14 }
 0xa1f   : > { %v1674_v28 = vmul.f32 %v2573_v60, %v1664_v19  ;;  %v1861_v51 = vunpack.c.h.bf16 %v3377_v37  ;;  %v1846_v19 = vunpack.c.h.bf16 %v3403_v9  ;;  %v1895_v60 = vunpack.c.l.bf16 %v3321_v31  ;;  %v3432_v31 = vld [vmem:[#allocation7 + $0x17c] sm:$0xff] }
 0xa20   : > { %v1675_v40 = vmul.f32 %v2575_v30, %v1665_v35  ;;  %v3422_v35 = vld [vmem:[#allocation7 + $0x28] sm:$0xff]  ;;  %v1841_v50 = vunpack.c.h.bf16 %v3414_v23  ;;  %v1890_v30 = vunpack.c.l.bf16 %v3326_v48  ;;  %2021 = vmatpush.msra.mxu2 %v1935_v18  ;;  %v1885_v48 = vunpack.c.l.bf16 %v3335_v33 }
 0xa21   : > { %v1676_v25 = vsub.f32 1.0, %v1674_v28  ;;  %2040 = vmatpush.msrb.mxu3 %v1861_v51  ;;  %v3429_v28 = vld [vmem:[#allocation7 + $0x14] sm:$0xff]  ;;  %v1880_v51 = vunpack.c.l.bf16 %v3343_v7  ;;  %v1982_v33 = vunpack.c.l.bf16 %v3314_v42 }
 0xa22   : > { %v1677_v29 = vsub.f32 1.0, %v1675_v40  ;;  %v1836_v40 = vunpack.c.h.bf16 %v3422_v35  ;;  %2022 = vmatpush.msra.mxu2 %v1930_v27 }
 0xa23   : > { %v1678_v46 = vmul.f32 %v1676_v25, %v1610_v57  ;;  %2041 = vmatpush.msrb.mxu3 %v1856_v55  ;;  %v1920_v25 = vunpack.c.l.bf16 %v3432_v31  ;;  %v3440_v57 = vld [vmem:[#allocation7 + $0x1fc] sm:$0xff]  ;;  %v1977_v55 = vunpack.c.l.bf16 %v3317_v43  ;;  %v1865_v43 = vunpack.c.l.bf16 %v3368_v36 }
 0xa24   : > { %v1679_v34 = vmul.f32 %v1677_v29, %v1611_v49  ;;  %v1831_v29 = vunpack.c.h.bf16 %v3429_v28  ;;  %v1953_v45 = vunpack.c.h.bf16 %v3440_v57  ;;  %2023 = vmatpush.msra.mxu2 %v1925_v38  ;;  %v3446_v49 = vld [vmem:[#allocation7 + $0x154] sm:$0xff]  ;;  %v1952_v27 = vunpack.c.l.bf16 %v3440_v57  ;;  %v3490_v57 = vld [vmem:[#allocation7 + $0x1c0] sm:$0xff] }
 0xa25   : > { %v1680_v62 = vadd.f32 1.0, %v1678_v46  ;;  %2042 = vmatpush.msrb.mxu3 %v1851_v13  ;;  %v1915_v46 = vunpack.c.l.bf16 %v3438_v41  ;;  %v1910_v21 = vunpack.c.l.bf16 %v3446_v49  ;;  %v1860_v13 = vunpack.c.l.bf16 %v3377_v37  ;;  %v3473_v36 = vld [vmem:[#allocation7 + $0xf8] sm:$0xff]  ;;  %v3478_v37 = vld [vmem:[#allocation7 + $0xe4] sm:$0xff] }
 0xa26   : > { %v1681_v8 = vadd.f32 1.0, %v1679_v34  ;;  %v1826_v34 = vunpack.c.h.bf16 %v3435_v32  ;;  %2138 = vmatpush.msrb.mxu0 %v1953_v45  ;;  %2024 = vmatpush.msra.mxu2 %v1920_v25  ;;  %v1887_v18 = vunpack.c.l.bf16 %v3473_v36  ;;  %v1840_v25 = vunpack.c.l.bf16 %v3414_v23 }
 0xa27   : > { %v1682_v12 = vmul.f32 %v1680_v62, %v1604_v61  ;;  %2043 = vmatpush.msrb.mxu3 %v1846_v19  ;;  %v3453_v61 = vld [vmem:[#allocation7 + $0x140] sm:$0xff]  ;;  %v1875_v62 = vunpack.c.l.bf16 %v3352_v63  ;;  %v1897_v63 = vunpack.c.l.bf16 %v3463_v24  ;;  %v1957_v19 = vunpack.c.l.bf16 %v3400_v52  ;;  %v1799_v52 = vld [vmem:[#allocation7 + $0x1d4] sm:$0xff] }
 0xa28   : > { %v1683_v2 = vmul.f32 %v1681_v8, %v1605_v4  ;;  %2025 = vmatpush.msra.mxu2 %v1915_v46  ;;  %v1905_v7 = vunpack.c.l.bf16 %v3453_v61  ;;  %v3458_v4 = vld [vmem:[#allocation7 + $0x134] sm:$0xff]  ;;  %v1870_v8 = vunpack.c.l.bf16 %v3358_v17  ;;  %v1802_v17 = vld [vmem:[#allocation7 + $0x1e8] sm:$0xff]  ;;  %v1835_v45 = vunpack.c.l.bf16 %v3422_v35 }
 0xa29   : > { %1704 = vmatpush.msrb.mxu1 %v1682_v12  ;;  %2044 = vmatpush.msrb.mxu3 %v1841_v50  ;;  %v1902_v42 = vunpack.c.l.bf16 %v3458_v4  ;;  %v1967_v12 = vunpack.c.l.bf16 %v3338_v56  ;;  %v1855_v56 = vunpack.c.l.bf16 %v3384_v44  ;;  %v3483_v50 = vld [vmem:[#allocation7 + $0xd0] sm:$0xff]  ;;  %v1845_v44 = vunpack.c.l.bf16 %v3403_v9  ;;  %v3493_v9 = vld [vmem:[#allocation7 + $0xa8] sm:$0xff] }
 0xa2a   : > { %2451 = vmatmul.msk.f32.vlgmr.msrb.gmra.mxu1 %vm1685_vm10, %v1684_v0  ;;  %2026 = vmatpush.msra.mxu2 %v1910_v21  ;;  %v1947_v38 = vunpack.c.l.bf16 %v1802_v17  ;;  %v3496_v46 = vld [vmem:[#allocation7 + $0x1ac] sm:$0xff]  ;;  %v1937_v23 = vunpack.c.l.bf16 %v3490_v57  ;;  %v3503_v21 = vld [vmem:[#allocation7 + $0x198] sm:$0xff] }
 0xa2b   : > { %1724 = vmatpush.msra.mxu1 %v1683_v2  ;;  %2045 = vmatpush.msrb.mxu3 %v1836_v40  ;;  %v1948_v2 = vunpack.c.h.bf16 %v1802_v17  ;;  %v3487_v40 = vld [vmem:[#allocation7 + $0xbc] sm:$0xff]  ;;  %v1932_v35 = vunpack.c.l.bf16 %v3496_v46 }
 0xa2c   : > { %2027 = vmatpush.msra.mxu2 %v1905_v7  ;;  %v1825_v7 = vunpack.c.l.bf16 %v3435_v32  ;;  %v1976_v32 = vunpack.c.h.bf16 %v3340_v5 }
 0xa2d   : > { %1992 = vmatpush.msrb.mxu1 %v1900_v15  ;;  %2046 = vmatpush.msrb.mxu3 %v1831_v29  ;;  %v1962_v15 = vunpack.c.l.bf16 %v3365_v16  ;;  %v1882_v16 = vunpack.c.l.bf16 %v3478_v37  ;;  %v1942_v29 = vunpack.c.l.bf16 %v1799_v52 }
 0xa2e   : > { %2072 = vmatpush.msrb.mxu2 %v1902_v42  ;;  %2139 = vmatpush.msrb.mxu0 %v1948_v2  ;;  %v1966_v2 = vunpack.c.h.bf16 %v3356_v54  ;;  %v1941_v54 = vunpack.c.h.bf16 %v3398_v6  ;;  %v1938_v6 = vunpack.c.h.bf16 %v3490_v57 }
 0xa2f   : > { %1993 = vmatpush.msrb.mxu1 %v1895_v60  ;;  %2047 = vmatpush.msrb.mxu3 %v1826_v34  ;;  %v1850_v60 = vunpack.c.l.bf16 %v3393_v59  ;;  %v1943_v59 = vunpack.c.h.bf16 %v1799_v52  ;;  %v3500_v34 = vld [vmem:[#allocation7 + $0x94] sm:$0xff] }
 0xa30   : > { %2073 = vmatpush.msrb.mxu2 %v1897_v63  ;;  %v3517_v63 = vld [vmem:[#allocation7 + $0x170] sm:$0xff] }
 0xa31   : > { %1994 = vmatpush.msrb.mxu1 %v1890_v30  ;;  %2092 = vmatpush.msra.mxu3 %v1982_v33  ;;  %v1877_v30 = vunpack.c.l.bf16 %v3483_v50  ;;  %v1830_v33 = vunpack.c.l.bf16 %v3429_v28  ;;  %v1981_v28 = vunpack.c.h.bf16 %v3331_v22  ;;  %v1971_v22 = vunpack.c.h.bf16 %v3349_v11 }
 0xa32   : > { %2452 = vmatmul.msk.f32.vlgmr.msra.gmra.mxu1 %vm1685_vm10, %v1684_v0  ;;  %v3468_v0 = vld [vmem:[#allocation7 + $0x10c] sm:$0xff]  ;;  %2140 = vmatpush.msrb.mxu0 %v1943_v59  ;;  %v1951_v11 = vunpack.c.h.bf16 %v3381_v3  ;;  %v1916_v3 = vunpack.c.h.bf16 %v3438_v41  ;;  %v1928_v41 = vunpack.c.h.bf16 %v3503_v21 }
 0xa33   : > { %1995 = vmatpush.msrb.mxu1 %v1885_v48  ;;  %2093 = vmatpush.msra.mxu3 %v1977_v55  ;;  %v1892_v47 = vunpack.c.l.bf16 %v3468_v0  ;;  %v1872_v48 = vunpack.c.l.bf16 %v3487_v40  ;;  %v3507_v55 = vld [vmem:[#allocation7 + $0x80] sm:$0xff] }
 0xa34   : > { %v1857_v42 = vunpack.c.l.bf16 %v3507_v55  ;;  %2141 = vmatpush.msrb.mxu0 %v1938_v6  ;;  %v1797_v6 = vld [vmem:[#allocation7 + $0x1c8] sm:$0xf] }
 0xa35   : > { %1996 = vmatpush.msrb.mxu1 %v1880_v51  ;;  %2094 = vmatpush.msra.mxu3 %v1972_v1  ;;  %v1867_v51 = vunpack.c.l.bf16 %v3493_v9  ;;  %v1927_v1 = vunpack.c.l.bf16 %v3503_v21  ;;  %v1818_v21 = vld [vmem:[#allocation7 + $0x254] sm:$0xf] }
 0xa36   : > { %2074 = vmatpush.msrb.mxu2 %v1892_v47  ;;  %v1917_v47 = vunpack.c.l.bf16 %v3517_v63 }
 0xa37   : > { %1997 = vmatpush.msrb.mxu1 %v1875_v62  ;;  %2095 = vmatpush.msra.mxu3 %v1967_v12  ;;  %v1862_v62 = vunpack.c.l.bf16 %v3500_v34 }
 0xa38   : > { %2075 = vmatpush.msrb.mxu2 %v1887_v18  ;;  %v1946_v18 = vunpack.c.h.bf16 %v3391_v53  ;;  %v1911_v53 = vunpack.c.h.bf16 %v3446_v49 }
 0xa39   : > { %1998 = vmatpush.msrb.mxu1 %v1870_v8  ;;  %2096 = vmatpush.msra.mxu3 %v1962_v15  ;;  %v3510_v8 = vld [vmem:[#allocation7 + $0x184] sm:$0xff]  ;;  %v1961_v15 = vunpack.c.h.bf16 %v3363_v26  ;;  %v1931_v26 = vunpack.c.h.bf16 %v3418_v20  ;;  %v3541_v20 = vld [vmem:[#allocation7 + $0x58] sm:$0xff] }
 0xa3a   : > { %2076 = vmatpush.msrb.mxu2 %v1882_v16  ;;  %v1922_v17 = vunpack.c.l.bf16 %v3510_v8  ;;  %v1778_v16 = vld [vmem:[#allocation7 + $0x148] sm:$0xff]  ;;  %v1923_v52 = vunpack.c.h.bf16 %v3510_v8  ;;  %v1815_v8 = vld [vmem:[#allocation7 + $0x240] sm:$0xf] }
 0xa3b   : > { %1999 = vmatpush.msrb.mxu1 %v1865_v43  ;;  %2097 = vmatpush.msra.mxu3 %v1957_v19  ;;  %v3515_v43 = vld [vmem:[#allocation7 + $0x6c] sm:$0xff]  ;;  %v1936_v19 = vunpack.c.h.bf16 %v3411_v14  ;;  %v1933_v14 = vunpack.c.h.bf16 %v3496_v46  ;;  %v1824_v46 = vld [vmem:[#allocation7 + $0x27c] sm:$0xf] }
 0xa3c   : > { %2077 = vmatpush.msrb.mxu2 %v1877_v30  ;;  %v1852_v12 = vunpack.c.l.bf16 %v3515_v43  ;;  %v3550_v30 = vld [vmem:[#allocation7 + $0x30] sm:$0xff] }
 0xa3d   : > { %2000 = vmatpush.msrb.mxu1 %v1860_v13  ;;  %2098 = vmatpush.msra.mxu3 %v1952_v27  ;;  %v3522_v13 = vld [vmem:[#allocation7 + $0x15c] sm:$0xff]  ;;  %v1907_v27 = vunpack.c.l.bf16 %v1778_v16 }
 0xa3e   : > { %2078 = vmatpush.msrb.mxu2 %v1872_v48  ;;  %v1912_v5 = vunpack.c.l.bf16 %v3522_v13  ;;  %2142 = vmatpush.msrb.mxu0 %v1933_v14  ;;  %v1918_v48 = vunpack.c.h.bf16 %v3517_v63  ;;  %v1969_v63 = vunpack.c.l.bf16 %v1815_v8 }
 0xa3f   : > { %2001 = vmatpush.msrb.mxu1 %v1855_v56  ;;  %2099 = vmatpush.msra.mxu3 %v1947_v38  ;;  %v1956_v56 = vunpack.c.h.bf16 %v3374_v39  ;;  %v1921_v39 = vunpack.c.h.bf16 %v3432_v31  ;;  %v1847_v31 = vunpack.c.l.bf16 %v3541_v20  ;;  %v3553_v38 = vld [vmem:[#allocation7 + $0x1c] sm:$0xff] }
 0xa40   : > { %2079 = vmatpush.msrb.mxu2 %v1867_v51  ;;  %2143 = vmatpush.msrb.mxu0 %v1928_v41  ;;  %v1832_v59 = vunpack.c.l.bf16 %v3553_v38  ;;  %v1821_v51 = vld [vmem:[#allocation7 + $0x268] sm:$0xf]  ;;  %v1755_v41 = vld [vmem:[#allocation7 + $0xb0] sm:$0xf]  ;;  %v1833_v8 = vunpack.c.h.bf16 %v3553_v38  ;;  %v1734_v38 = vld [vmem:[#allocation7 + $0x24] sm:$0xf] }
 0xa41   : > { %2002 = vmatpush.msrb.mxu1 %v1850_v60  ;;  %2100 = vmatpush.msra.mxu3 %v1942_v29  ;;  %v1926_v60 = vunpack.c.h.bf16 %v3426_v58  ;;  %v1906_v58 = vunpack.c.h.bf16 %v3453_v61  ;;  %v1837_v61 = vunpack.c.l.bf16 %v3550_v30  ;;  %v1913_v29 = vunpack.c.h.bf16 %v3522_v13  ;;  %v1809_v13 = vld [vmem:[#allocation7 + $0x218] sm:$0xf] }
 0xa42   : > { %2080 = vmatpush.msrb.mxu2 %v1862_v62  ;;  %2144 = vmatpush.msrb.mxu0 %v1923_v52 }
 0xa43   : > { %2003 = vmatpush.msrb.mxu1 %v1845_v44  ;;  %2101 = vmatpush.msra.mxu3 %v1937_v23  ;;  %v3546_v44 = vld [vmem:[#allocation7 + $0x44] sm:$0xff]  ;;  %v1903_v23 = vunpack.c.h.bf16 %v3458_v4  ;;  %v1888_v4 = vunpack.c.h.bf16 %v3473_v36  ;;  %v1959_v36 = vunpack.c.l.bf16 %v1809_v13  ;;  %v1834_v13 = vunpack.c.l.bf16 %v1734_v38 }
 0xa44   : > { %2081 = vmatpush.msrb.mxu2 %v1857_v42  ;;  %v1842_v49 = vunpack.c.l.bf16 %v3546_v44  ;;  %2145 = vmatpush.msrb.mxu0 %v1918_v48  ;;  %v1893_v42 = vunpack.c.h.bf16 %v3468_v0  ;;  %v1869_v48 = vunpack.c.l.bf16 %v1755_v41 }
 0xa45   : > { %2004 = vmatpush.msrb.mxu1 %v1840_v25  ;;  %2102 = vmatpush.msra.mxu3 %v1932_v35  ;;  %v3556_v25 = vld [vmem:[#allocation7 + $0x8] sm:$0xff]  ;;  %v1898_v35 = vunpack.c.h.bf16 %v3463_v24  ;;  %v1883_v24 = vunpack.c.h.bf16 %v3478_v37  ;;  %v1873_v37 = vunpack.c.h.bf16 %v3487_v40 }
 0xa46   : > { %2082 = vmatpush.msrb.mxu2 %v1852_v12  ;;  %v1827_v57 = vunpack.c.l.bf16 %v3556_v25  ;;  %2146 = vmatpush.msrb.mxu0 %v1913_v29  ;;  %v1812_v12 = vld [vmem:[#allocation7 + $0x22c] sm:$0xf] }
 0xa47   : > { %2005 = vmatpush.msrb.mxu1 %v1835_v45  ;;  %2103 = vmatpush.msra.mxu3 %v1927_v1  ;;  %v1908_v45 = vunpack.c.h.bf16 %v1778_v16  ;;  %v1776_v1 = vld [vmem:[#allocation7 + $0x13c] sm:$0xf]  ;;  %v1858_v16 = vunpack.c.h.bf16 %v3507_v55  ;;  %v1848_v55 = vunpack.c.h.bf16 %v3541_v20  ;;  %v1782_v20 = vld [vmem:[#allocation7 + $0x164] sm:$0xf] }
 0xa48   : > { %2083 = vmatpush.msrb.mxu2 %v1847_v31  ;;  %v1794_v31 = vld [vmem:[#allocation7 + $0x1b4] sm:$0xf] }
 0xa49   : > { %2006 = vmatpush.msrb.mxu1 %v1830_v33  ;;  %2104 = vmatpush.msra.mxu3 %v1922_v17  ;;  %v1984_v33 = vunpack.c.l.bf16 %v1824_v46  ;;  %v1904_v17 = vunpack.c.l.bf16 %v1776_v1  ;;  %v1785_v46 = vld [vmem:[#allocation7 + $0x178] sm:$0xf]  ;;  %v1914_v1 = vunpack.c.l.bf16 %v1782_v20 }
 0xa4a   : > { %2084 = vmatpush.msrb.mxu2 %v1842_v49  ;;  %2147 = vmatpush.msrb.mxu0 %v1908_v45  ;;  %v1791_v49 = vld [vmem:[#allocation7 + $0x1a0] sm:$0xf]  ;;  %v1843_v45 = vunpack.c.h.bf16 %v3546_v44  ;;  %v1779_v44 = vld [vmem:[#allocation7 + $0x150] sm:$0xf] }
 0xa4b   : > { %2007 = vmatpush.msrb.mxu1 %v1825_v7  ;;  %2105 = vmatpush.msra.mxu3 %v1917_v47  ;;  %v1979_v7 = vunpack.c.l.bf16 %v1821_v51  ;;  %v1770_v47 = vld [vmem:[#allocation7 + $0x114] sm:$0xf]  ;;  %v1929_v29 = vunpack.c.l.bf16 %v1791_v49 }
 0xa4c   : > { %2085 = vmatpush.msrb.mxu2 %v1837_v61  ;;  %v1934_v61 = vunpack.c.l.bf16 %v1794_v31 }
 0xa4d   : > { %2052 = vmatpush.msra.mxu1 %v1981_v28  ;;  %2106 = vmatpush.msra.mxu3 %v1912_v5  ;;  %v1974_v28 = vunpack.c.l.bf16 %v1818_v21  ;;  %v1746_v21 = vld [vmem:[#allocation7 + $0x74] sm:$0xf] }
 0xa4e   : > { %2086 = vmatpush.msrb.mxu2 %v1832_v59  ;;  %v1752_v59 = vld [vmem:[#allocation7 + $0x9c] sm:$0xf] }
 0xa4f   : > { %2053 = vmatpush.msra.mxu1 %v1976_v32  ;;  %2107 = vmatpush.msra.mxu3 %v1907_v27  ;;  %v1773_v32 = vld [vmem:[#allocation7 + $0x128] sm:$0xf]  ;;  %v1939_v27 = vunpack.c.l.bf16 %v1797_v6  ;;  %v1864_v51 = vunpack.c.l.bf16 %v1752_v59 }
 0xa50   : > { %2087 = vmatpush.msrb.mxu2 %v1827_v57  ;;  %v1899_v5 = vunpack.c.l.bf16 %v1773_v32  ;;  %v1788_v57 = vld [vmem:[#allocation7 + $0x18c] sm:$0xf]  ;;  %v1737_v32 = vld [vmem:[#allocation7 + $0x38] sm:$0xf] }
 0xa51   : > { %2054 = vmatpush.msra.mxu1 %v1971_v22  ;;  %v1964_v22 = vunpack.c.l.bf16 %v1812_v12  ;;  %v1909_v12 = vunpack.c.l.bf16 %v1779_v44 }
 0xa53   : > { %2055 = vmatpush.msra.mxu1 %v1966_v2  ;;  %v1878_v2 = vunpack.c.h.bf16 %v3483_v50  ;;  %v1868_v50 = vunpack.c.h.bf16 %v3493_v9 }
 0xa55   : > { %2056 = vmatpush.msra.mxu1 %v1961_v15  ;;  %v1806_v15 = vld [vmem:[#allocation7 + $0x204] sm:$0xf] }
 0xa57   : > { %2057 = vmatpush.msra.mxu1 %v1956_v56  ;;  %v1767_v56 = vld [vmem:[#allocation7 + $0x100] sm:$0xf] }
 0xa59   : > { %2058 = vmatpush.msra.mxu1 %v1951_v11  ;;  %v1894_v11 = vunpack.c.l.bf16 %v1770_v47 }
 0xa5b   : > { %2059 = vmatpush.msra.mxu1 %v1946_v18  ;;  %v1803_v18 = vld [vmem:[#allocation7 + $0x1f0] sm:$0xf] }
 0xa5d   : > { %2060 = vmatpush.msra.mxu1 %v1941_v54  ;;  %v1954_v54 = vunpack.c.l.bf16 %v1806_v15  ;;  %v1989_v15 = vpop.permute.xlu0 %1988 }
 0xa5f   : > { %2061 = vmatpush.msra.mxu1 %v1936_v19  ;;  %v1764_v19 = vld [vmem:[#allocation7 + $0xec] sm:$0xf] }
 0xa60   : > { %v1884_v40 = vunpack.c.l.bf16 %v1764_v19 }
 0xa61   : > { %2062 = vmatpush.msra.mxu1 %v1931_v26  ;;  %v1889_v26 = vunpack.c.l.bf16 %v1767_v56 }
 0xa63   : > { %2063 = vmatpush.msra.mxu1 %v1926_v60  ;;  %v1800_v60 = vld [vmem:[#allocation7 + $0x1dc] sm:$0xf] }
 0xa64   : > { %v1944_v14 = vunpack.c.l.bf16 %v1800_v60 }
 0xa65   : > { %2064 = vmatpush.msra.mxu1 %v1921_v39  ;;  %v1949_v39 = vunpack.c.l.bf16 %v1803_v18 }
 0xa67   : > { %2065 = vmatpush.msra.mxu1 %v1916_v3  ;;  %v1863_v3 = vunpack.c.h.bf16 %v3500_v34  ;;  %v1853_v34 = vunpack.c.h.bf16 %v3515_v43  ;;  %v1749_v43 = vld [vmem:[#allocation7 + $0x88] sm:$0xf] }
 0xa69   : > { %2066 = vmatpush.msra.mxu1 %v1911_v53  ;;  %v1761_v53 = vld [vmem:[#allocation7 + $0xd8] sm:$0xf] }
 0xa6a   : > { %v1879_v9 = vunpack.c.l.bf16 %v1761_v53 }
 0xa6b   : > { %2067 = vmatpush.msra.mxu1 %v1906_v58  ;;  %v1758_v58 = vld [vmem:[#allocation7 + $0xc4] sm:$0xf] }
 0xa6c   : > { %v1874_v52 = vunpack.c.l.bf16 %v1758_v58 }
 0xaa7   : > { %v3562_v62 = vpop.f32.mrf.mxu1 }
 0xaa8   : > { %2008 = vmatmul.f32.vlgmr.msrb.gmra.mxu1 %v3562_v62  ;;  %2048 = vmatmul.f32.vlgmr.msrb.gmra.mxu3 %v3562_v62 }
 0xaa9   : > { %2112 = vmatpush.msrb.mxu1 %v1903_v23  ;;  %2172 = vmatpush.msrb.mxu3 %v1984_v33  ;;  %v1924_v23 = vunpack.c.l.bf16 %v1788_v57  ;;  %v1838_v33 = vunpack.c.h.bf16 %v3550_v30 }
 0xaab   : > { %2113 = vmatpush.msrb.mxu1 %v1898_v35  ;;  %2173 = vmatpush.msrb.mxu3 %v1979_v7  ;;  %v1859_v35 = vunpack.c.l.bf16 %v1749_v43  ;;  %v1919_v7 = vunpack.c.l.bf16 %v1785_v46 }
 0xaad   : > { %2114 = vmatpush.msrb.mxu1 %v1893_v42  ;;  %2174 = vmatpush.msrb.mxu3 %v1974_v28  ;;  %v1743_v42 = vld [vmem:[#allocation7 + $0x60] sm:$0xf]  ;;  %v1854_v28 = vunpack.c.l.bf16 %v1746_v21 }
 0xaae   : > { %v1849_v30 = vunpack.c.l.bf16 %v1743_v42 }
 0xaaf   : > { %2115 = vmatpush.msrb.mxu1 %v1888_v4  ;;  %2175 = vmatpush.msrb.mxu3 %v1969_v63  ;;  %v3570_v0 = vpop.f32.mrf.mxu1  ;;  %v1828_v4 = vunpack.c.h.bf16 %v3556_v25  ;;  %v1740_v63 = vld [vmem:[#allocation7 + $0x4c] sm:$0xf]  ;;  %v1731_v25 = vld [vmem:[#allocation7 + $0x10] sm:$0xf] }
 0xab0   : > { %2028 = vmatmul.f32.vlgmr.msra.gmra.mxu2 %v3570_v0  ;;  %2068 = vmatmul.f32.vlgmr.msra.gmra.mxu1 %v3570_v0 }
 0xab1   : > { %2116 = vmatpush.msrb.mxu1 %v1883_v24  ;;  %2152 = vmatpush.msra.mxu2 %v1904_v17  ;;  %v1844_v24 = vunpack.c.l.bf16 %v1740_v63  ;;  %v1839_v17 = vunpack.c.l.bf16 %v1737_v32 }
 0xab2   : > { %2176 = vmatpush.msrb.mxu3 %v1964_v22  ;;  %2148 = vmatmul.f32.vlgmr.msrb.gmra.mxu0 %v3570_v0  ;;  %v1829_v22 = vunpack.c.l.bf16 %v1731_v25 }
 0xab3   : > { %2117 = vmatpush.msrb.mxu1 %v1878_v2  ;;  %2153 = vmatpush.msra.mxu2 %v1899_v5 }
 0xab4   : > { %2177 = vmatpush.msrb.mxu3 %v1959_v36  ;;  %v1991_v36 = vperm.slane %v1989_v15, 0 }
 0xab5   : > { %2118 = vmatpush.msrb.mxu1 %v1873_v37  ;;  %2154 = vmatpush.msra.mxu2 %v1894_v11 }
 0xab6   : > { %2178 = vmatpush.msrb.mxu3 %v1954_v54 }
 0xab7   : > { %2119 = vmatpush.msrb.mxu1 %v1868_v50  ;;  %2155 = vmatpush.msra.mxu2 %v1889_v26 }
 0xab8   : > { %2179 = vmatpush.msrb.mxu3 %v1949_v39  ;;  %2088 = vmatmul.f32.vlgmr.msrb.gmra.mxu2 %v3562_v62 }
 0xab9   : > { %2120 = vmatpush.msrb.mxu1 %v1863_v3  ;;  %2156 = vmatpush.msra.mxu2 %v1884_v40 }
 0xaba   : > { %2180 = vmatpush.msrb.mxu3 %v1944_v14 }
 0xabb   : > { %2108 = vmatmul.f32.vlgmr.msra.gmra.mxu3 %v3570_v0  ;;  %2121 = vmatpush.msrb.mxu1 %v1858_v16 }
 0xabc   : > { %2157 = vmatpush.msra.mxu2 %v1879_v9  ;;  %2181 = vmatpush.msrb.mxu3 %v1939_v27 }
 0xabd   : > { %2122 = vmatpush.msrb.mxu1 %v1853_v34 }
 0xabe   : > { %2158 = vmatpush.msra.mxu2 %v1874_v52  ;;  %2182 = vmatpush.msrb.mxu3 %v1934_v61 }
 0xabf   : > { %2123 = vmatpush.msrb.mxu1 %v1848_v55 }
 0xac0   : > { %2159 = vmatpush.msra.mxu2 %v1869_v48  ;;  %2183 = vmatpush.msrb.mxu3 %v1929_v29 }
 0xac1   : > { %2124 = vmatpush.msrb.mxu1 %v1843_v45 }
 0xac2   : > { %2160 = vmatpush.msra.mxu2 %v1864_v51  ;;  %2184 = vmatpush.msrb.mxu3 %v1924_v23 }
 0xac3   : > { %2125 = vmatpush.msrb.mxu1 %v1838_v33 }
 0xac4   : > { %2161 = vmatpush.msra.mxu2 %v1859_v35  ;;  %2185 = vmatpush.msrb.mxu3 %v1919_v7 }
 0xac5   : > { %2126 = vmatpush.msrb.mxu1 %v1833_v8 }
 0xac6   : > { %2162 = vmatpush.msra.mxu2 %v1854_v28  ;;  %2186 = vmatpush.msrb.mxu3 %v1914_v1 }
 0xac7   : > { %2127 = vmatpush.msrb.mxu1 %v1828_v4 }
 0xac8   : > { %2163 = vmatpush.msra.mxu2 %v1849_v30  ;;  %2187 = vmatpush.msrb.mxu3 %v1909_v12 }
 0xac9   : > { %2128 = vmatmul.f32.vlgmr.msrb.gmra.mxu1 %v3562_v62  ;;  %2188 = vmatmul.f32.vlgmr.msrb.gmra.mxu3 %v3570_v0 }
 0xaca   : > { %2164 = vmatpush.msra.mxu2 %v1844_v24 }
 0xacc   : > { %2165 = vmatpush.msra.mxu2 %v1839_v17 }
 0xace   : > { %2166 = vmatpush.msra.mxu2 %v1834_v13 }
 0xad0   : > { %2167 = vmatpush.msra.mxu2 %v1829_v22 }
 0xad1   : > { %2168 = vmatmul.f32.vlgmr.msra.gmra.mxu2 %v3562_v62 }
 0xb25   : > { %v2009_v2 = vpop.f32.mrf.mxu1 }
 0xb26   : > { %v2010_v19 = vadd.f32 %v2009_v2, %v1991_v36 }
 0xb2b   : > { %v2049_v5 = vpop.f32.mrf.mxu3 }
 0xb2c   : > { %v2050_v11 = vadd.f32 %v2049_v5, %v1991_v36 }
 0xb2d   : > { %v2069_v18 = vpop.f32.mrf.mxu1 }
 0xb2e   : > { %v2070_v50 = vadd.f32 %v2069_v18, %v2050_v11 }
 0xb2f   : > { %v2149_v62 = vpop.f32.mrf.mxu0 }
 0xb30   : > { %v2454_v39 = vmul.f32 -1.442695, %v2070_v50 }
 0xb33   : > { %v2029_v47 = vpop.f32.mrf.mxu2 }
 0xb34   : > { %v2030_v26 = vadd.f32 %v2029_v47, %v2010_v19 }
 0xb36   : > { %v2453_v40 = vmul.f32 -1.442695, %v2030_v26 }
 0xb3b   : > { %v2089_v56 = vpop.f32.mrf.mxu2 }
 0xb3c   : > { %v2090_v37 = vadd.f32 %v2089_v56, %v1991_v36 }
 0xb3e   : > { %v2109_v54 = vpop.f32.mrf.mxu3 }
 0xb3f   : > { %v2110_v0 = vadd.f32 %v2109_v54, %v2090_v37 }
 0xb41   : > { %v2455_v60 = vmul.f32 -1.442695, %v2110_v0 }
 0xb43   : > { %2576 = vpow2.f32 %v2455_v60 }
 0xb44   : > { %2578 = vpow2.f32 %v2454_v39 }
 0xb45   : > { %2580 = vpow2.f32 %v2453_v40 }
 0xb46   : > { %v2129_v3 = vpop.f32.mrf.mxu1 }
 0xb47   : > { %v2130_v53 = vadd.f32 %v2129_v3, %v1991_v36 }
 0xb49   : > { %v2150_v6 = vadd.f32 %v2149_v62, %v2130_v53  ;;  %v2577_v16 = vpop.eup %2576 }
 0xb4a   : > { %v2579_v58 = vpop.eup %2578  ;;  %v3591_v9 = vadd.f32 1.0, %v2577_v16 }
 0xb4b   : > { %v2456_v14 = vmul.f32 -1.442695, %v2150_v6  ;;  %v2581_v31 = vpop.eup %2580  ;;  %v2208_v27 = vadd.f32 1.0, %v2579_v58 }
 0xb4c   : > { %v3593_v41 = vadd.f32 1.0, %v2581_v31  ;;  %v2189_v55 = vpop.f32.mrf.mxu3  ;;  %v2251_v13 = vand.u32 2147483647, %v3591_v9  ;;  %v2253_v22 = vand.u32 2147483648, %v3591_v9  ;;  %vm2247_vm0 = vweird.f32 %v3591_v9 }
 0xb4d   : > { %2582 = vpow2.f32 %v2456_v14  ;;  %v2236_v42 = vand.u32 2147483647, %v2208_v27  ;;  %v2238_v44 = vand.u32 2147483648, %v2208_v27  ;;  %vm2232_vm11 = vweird.f32 %v2208_v27 }
 0xb4e   : > { %2584 = vrcp.f32 %v3591_v9  ;;  %vm2217_vm13 = vweird.f32 %v3593_v41  ;;  %v2221_v24 = vand.u32 2147483647, %v3593_v41  ;;  %v2223_v15 = vand.u32 2147483648, %v3593_v41 }
 0xb4f   : > { %2586 = vrcp.f32 %v2208_v27  ;;  %vm3617_vm12 = vcmp.eq.f32.partialorder %v2236_v42, 8.507059e+37  ;;  %v2239_v12 = vor.u32 1.1754944e-38, %v2238_v44  ;;  %vm2252_vm3 = vcmp.eq.f32.partialorder %v2251_v13, 8.507059e+37 }
 0xb50   : > { %v2254_v19 = vor.u32 1.1754944e-38, %v2253_v22  ;;  %v2224_v62 = vor.u32 1.1754944e-38, %v2223_v15 }
 0xb53   : > { %v2583_v34 = vpop.eup %2582 }
 0xb54   : > { %v2169_v49 = vpop.f32.mrf.mxu2  ;;  %v3596_v52 = vadd.f32 1.0, %v2583_v34  ;;  %v2585_v48 = vpop.eup %2584 }
 0xb55   : > { %v2170_v61 = vadd.f32 %v2169_v49, %v1991_v36  ;;  %v3600_v29 = vpop.eup %2586  ;;  %v2243_v46 = vmul.f32 %v2585_v48, %v3591_v9  ;;  %vm2248_vm14 = vweird.f32 %v2585_v48 }
 0xb56   : > { %2588 = vrcp.f32 %v3596_v52  ;;  %v2228_v51 = vmul.f32 %v3600_v29, %v2208_v27  ;;  %vm2233_vm15 = vweird.f32 %v3600_v29  ;;  %vm3635_vm5 = vmor %vm2247_vm0, %vm2248_vm14  ;;  %v2268_v56 = vand.u32 2147483648, %v3596_v52 }
 0xb57   : > { %2590 = vrcp.f32 %v3593_v41  ;;  %v2190_v59 = vadd.f32 %v2189_v55, %v2170_v61  ;;  %v2244_v20 = vsub.f32 1.0, %v2243_v46  ;;  %vm3641_vm6 = vmor %vm2232_vm11, %vm2233_vm15  ;;  %vm2262_vm2 = vweird.f32 %v3596_v52 }
 0xb58   : > { %v2229_v35 = vsub.f32 1.0, %v2228_v51  ;;  %v2266_v18 = vand.u32 2147483647, %v3596_v52  ;;  %v2269_v14 = vor.u32 1.1754944e-38, %v2268_v56  ;;  %vm2296_vm14 = vcmask 1040384  }
 0xb59   : > { %v2457_v57 = vmul.f32 -1.442695, %v2190_v59  ;;  %v2245_v1 = vmul.f32 %v2585_v48, %v2244_v20 }
 0xb5a   : > { %v2230_v4 = vmul.f32 %v3600_v29, %v2229_v35  ;;  %vm2267_vm10 = vcmp.eq.f32.partialorder %v2266_v18, 8.507059e+37 }
 0xb5b   : > { %2592 = vpow2.f32 %v2457_v57  ;;  %v2246_v38 = vadd.f32 %v2585_v48, %v2245_v1 }
 0xb5c   : > { %v3602_v45 = vpop.eup %2588  ;;  %v2231_v25 = vadd.f32 %v3600_v29, %v2230_v4 }
 0xb5d   : > { %v3604_v43 = vpop.eup %2590  ;;  %v2258_v23 = vmul.f32 %v3602_v45, %v3596_v52  ;;  %vm2263_vm1 = vweird.f32 %v3602_v45  ;;  %v2250_v11 = vsel %vm3635_vm5, %v2585_v48, %v2246_v38  ;;  %vm2307_vm5 = vcmp.lt.s32.totalorder %v1414_v10, 576 }
 0xb5e   : > { %v2213_v33 = vmul.f32 %v3604_v43, %v3593_v41  ;;  %vm2218_vm4 = vweird.f32 %v3604_v43  ;;  %v2235_v0 = vsel %vm3641_vm6, %v3600_v29, %v2231_v25  ;;  %vm3654_vm7 = vmor %vm2262_vm2, %vm2263_vm1  ;;  %v2255_v6 = vsel %vm2252_vm3, %v2254_v19, %v2250_v11 }
 0xb5f   : > { %v2259_v8 = vsub.f32 1.0, %v2258_v23  ;;  %vm3661_vm8 = vmor %vm2217_vm13, %vm2218_vm4  ;;  %v2240_v16 = vsel %vm3617_vm12, %v2239_v12, %v2235_v0  ;;  %vm2222_vm13 = vcmp.eq.f32.partialorder %v2221_v24, 8.507059e+37  ;;  %v2293_v34 = vrot.slane %v2255_v6, 6 }
 0xb60   : > { %v2214_v28 = vsub.f32 1.0, %v2213_v33  ;;  %v2292_v49 = vrot.slane %v2240_v16, 7  ;;  %vm2298_vm1 = vcmask 1041408   ;;  %vm2300_vm4 = vcmask 1043459  }
 0xb61   : > { %v2593_v21 = vpop.eup %2592  ;;  %v2260_v63 = vmul.f32 %v3602_v45, %v2259_v8  ;;  %vm2302_vm12 = vcmask 1042432  }
 0xb62   : > { %v3612_v7 = vadd.f32 1.0, %v2593_v21  ;;  %v2215_v32 = vmul.f32 %v3604_v43, %v2214_v28 }
 0xb63   : > { %v2261_v47 = vadd.f32 %v3602_v45, %v2260_v63 }
 0xb64   : > { %2594 = vrcp.f32 %v3612_v7  ;;  %v2216_v5 = vadd.f32 %v3604_v43, %v2215_v32  ;;  %v2283_v26 = vand.u32 2147483648, %v3612_v7  ;;  %v2281_v40 = vand.u32 2147483647, %v3612_v7 }
 0xb65   : > { %v2265_v39 = vsel %vm3654_vm7, %v3602_v45, %v2261_v47  ;;  %vm2277_vm11 = vweird.f32 %v3612_v7 }
 0xb66   : > { %v2220_v53 = vsel %vm3661_vm8, %v3604_v43, %v2216_v5  ;;  %v2270_v31 = vsel %vm2267_vm10, %v2269_v14, %v2265_v39  ;;  %v2284_v9 = vor.u32 1.1754944e-38, %v2283_v26  ;;  %vm2282_vm0 = vcmp.eq.f32.partialorder %v2281_v40, 8.507059e+37 }
 0xb67   : > { %v2225_v27 = vsel %vm2222_vm13, %v2224_v62, %v2220_v53  ;;  %v2294_v61 = vrot.slane %v2270_v31, 5 }
 0xb68   : > { %v2297_v59 = vsel %vm2296_vm14, %v2225_v27, %v2292_v49 }
 0xb69   : > { %v2299_v57 = vsel %vm2298_vm1, %v2297_v59, %v2293_v34 }
 0xb6a   : > { %v2595_v17 = vpop.eup %2594 }
 0xb6b   : > { %v2273_v2 = vmul.f32 %v2595_v17, %v3612_v7  ;;  %vm2278_vm9 = vweird.f32 %v2595_v17 }
 0xb6c   : > { %vm2279_vm15 = vmor %vm2277_vm11, %vm2278_vm9 }
 0xb6d   : > { %v2274_v54 = vsub.f32 1.0, %v2273_v2 }
 0xb6f   : > { %v2275_v3 = vmul.f32 %v2595_v17, %v2274_v54 }
 0xb71   : > { %v2276_v58 = vadd.f32 %v2595_v17, %v2275_v3 }
 0xb73   : > { %v2280_v41 = vsel %vm2279_vm15, %v2595_v17, %v2276_v58 }
 0xb74   : > { %v2285_v52 = vsel %vm2282_vm0, %v2284_v9, %v2280_v41 }
 0xb75   : > { %v2295_v55 = vrot.slane %v2285_v52, 4 }
 0xb77   : > { %v2301_v48 = vsel %vm2300_vm4, %v2294_v61, %v2295_v55 }
 0xb78   : > { %v2303_v29 = vsel %vm2302_vm12, %v2299_v57, %v2301_v48 }
 0xb79   : > { %2309 = vst.msk [vmem:[%s571_s27] sm:$0x1f] %vm2307_vm5, %v2303_v29 }
 0xb7a PF: > { %s3723_s15 = sld [smem:[#allocation10_spill]] }
 0xb80   : > { %s30_s23 = sadd.s32 1, %s3723_s15  }
 0xb81   : > { %p27_p7 = scmp.ge.s32.totalorder %s30_s23, 4  }
 0xb83   :  { %29 = sbr.rel (!%p27_p7) target bundleno = 7 (0x7), region = 134 }
 0xb88   :  { %2329 = vsyncpa [#allocation4], 1 }
 0xb89   :  { %2331 = vsyncpa [#allocation4 + $0x1], 1 }
 0xb8a   :  { %2332 = vsyncpa [#allocation6], 1 }

</bundles_post_ra>
